<compile_context>
chip_gen: v6e
topology: v6e:2x2x1
jax: 0.10.0
libtpu: 0.0.40
codegen_flags: <defaults>
</compile_context>

<pallas_src>
import math
from functools import partial

import jax
import jax.numpy as jnp
import numpy as np
from jax.experimental import pallas as pl
from jax.experimental.pallas import tpu as pltpu

LEAKY_SLOPE = 0.01          # F.leaky_relu default
BETA_SCALE = 100.0
PROB_MIN = 1e-8
PROB_MAX = 0.9999999
X_MIN = 1e-5
X_MAX = 1.0 - 1e-5

_LOG2 = math.log(2.0)
_HALF_LOG_2PI = 0.5 * math.log(2.0 * math.pi)
_LGAMMA_BETA_SUM = math.lgamma(BETA_SCALE)   # lgamma(a + b) == lgamma(100): a constant

_LANE = 128
_SUBLANE = 8


def _round_up(v, m):
    return ((v + m - 1) // m) * m


def _leaky_relu(x):
    return jnp.where(x > 0, x, LEAKY_SLOPE * x)


def _lgamma_pair(a, b):
    """lgamma(a) + lgamma(b) for a, b in (0, 100].

    Each lgamma uses the shift-by-8 Stirling form
        lgamma(x) = Stirling(x + 8) - log(x (x+1) ... (x+7)).
    The two shift-product logs are fused into ONE log of the joint product
    (p_a * p_b <= ~4e27 << f32 max since a + b == 100), cutting one EUP log per
    pixel out of the dominant Beta-log-likelihood phase; the extra multiplies
    ride the 4-wide VALU which has slack.  The reciprocals feeding the Stirling
    correction use the cheap approximate EUP path; their error only enters
    through the <= 0.0105 correction series.
    """
    pa, ya = a, a
    pb, yb = b, b
    for _ in range(7):
        ya = ya + 1.0
        pa = pa * ya
        yb = yb + 1.0
        pb = pb * yb
    ya = ya + 1.0                                  # a + 8
    yb = yb + 1.0                                  # b + 8
    inva = pl.reciprocal(ya, approx=True)
    invb = pl.reciprocal(yb, approx=True)
    inva2 = inva * inva
    invb2 = invb * invb
    ser = (inva * (1.0 / 12.0 - inva2 * (1.0 / 360.0 - inva2 * (1.0 / 1260.0)))
           + invb * (1.0 / 12.0 - invb2 * (1.0 / 360.0 - invb2 * (1.0 / 1260.0))))
    stirling = ((ya - 0.5) * jnp.log(ya) + (yb - 0.5) * jnp.log(yb)
                - ya - yb + 2.0 * _HALF_LOG_2PI + ser)
    return stirling - jnp.log(pa * pb)


# -----------------------------------------------------------------------------
# Shared kernel math: encoder -> sample -> KL -> decoder -> Beta log-likelihood
# -----------------------------------------------------------------------------
def _vae_math(x, u, log_xn, log_1mxn,
              w1, b1, w2, b2, w3, b3, w4, b4,
              z_ref, alpha_ref, kl_ref, logpx_ref):
    # ---------------- encoder: q(z|x) Bernoulli logits + hard sample --------
    h = jnp.dot(x.astype(jnp.bfloat16), w1, preferred_element_type=jnp.float32) + b1
    h = _leaky_relu(h)
    logits = jnp.dot(h.astype(jnp.bfloat16), w2, preferred_element_type=jnp.float32) + b2

    e = jnp.exp(-jnp.abs(logits))            # shared by sigmoid and softplus
    r = 1.0 / (1.0 + e)
    q = jnp.where(logits >= 0, r, e * r)     # sigmoid(logits), overflow-free
    z = (u < q).astype(jnp.float32)
    z_ref[...] = z

    # ---------------- KL(q(z|x) || Bernoulli(0.5)) straight from logits -----
    # log q = -softplus(-logits), log(1-q) = -softplus(logits); no clamp,
    # no divide-by-0.5, no second sigmoid (differs from the clamped-probability
    # form of the reference by < 2e-6 per element).
    sp_neg = jnp.log(1.0 + e) + jnp.maximum(-logits, 0.0)    # softplus(-logits)
    sp_pos = sp_neg + logits                                 # softplus(logits)
    kl = q * (-sp_neg) + (1.0 - q) * (-sp_pos) + _LOG2
    kl_row = jnp.sum(kl, axis=1, keepdims=True)
    kl_ref[...] = jnp.broadcast_to(kl_row, kl_ref.shape)     # lane-dense store

    # ---------------- decoder + Beta(100a, 100(1-a)) log-likelihood ---------
    h2 = jnp.dot(z.astype(jnp.bfloat16), w3, preferred_element_type=jnp.float32) + b3
    h2 = _leaky_relu(h2)
    x_hat = jnp.dot(h2.astype(jnp.bfloat16), w4, preferred_element_type=jnp.float32) + b4

    e2 = jnp.exp(-jnp.abs(x_hat))
    r2 = 1.0 / (1.0 + e2)
    alpha = jnp.where(x_hat >= 0, r2, e2 * r2)         # sigmoid(x_hat)
    one_m_alpha = jnp.where(x_hat >= 0, e2 * r2, r2)   # sigmoid(-x_hat): exact
    alpha_ref[...] = alpha                             # complement -> no 100-a
                                                       # cancellation at saturation
    # Lower-bound clip so lgamma never sees 0 even if the sigmoid saturates in f32.
    a = BETA_SCALE * jnp.maximum(alpha, PROB_MIN)
    b = BETA_SCALE * jnp.maximum(one_m_alpha, 1.0 - PROB_MAX)

    # lgamma(a + b) == lgamma(100) is constant -> added once per row below.
    logpx = (a - 1.0) * log_xn + (b - 1.0) * log_1mxn - _lgamma_pair(a, b)
    logpx_row = (jnp.sum(logpx, axis=1, keepdims=True)
                 + log_xn.shape[1] * _LGAMMA_BETA_SUM)
    logpx_ref[...] = jnp.broadcast_to(logpx_row, logpx_ref.shape)


def _vae_kernel_precomputed(x_ref, u_ref, logx_ref, log1mx_ref,
                            w1_ref, b1_ref, w2_ref, b2_ref,
                            w3_ref, b3_ref, w4_ref, b4_ref,
                            z_ref, alpha_ref, kl_ref, logpx_ref):
    # v6e/v7x variant: log(x_noise) / log(1 - x_noise) come from a mem-bound XLA
    # prologue, so the EUP in this (EUP-bound) kernel sees 3 logs + 2 recips/pixel.
    _vae_math(x_ref[...], u_ref[...], logx_ref[...], log1mx_ref[...],
              w1_ref[...], b1_ref[...], w2_ref[...], b2_ref[...],
              w3_ref[...], b3_ref[...], w4_ref[...], b4_ref[...],
              z_ref, alpha_ref, kl_ref, logpx_ref)


def _vae_kernel_inkernel_logs(x_ref, u_ref, noise_ref,
                              w1_ref, b1_ref, w2_ref, b2_ref,
                              w3_ref, b3_ref, w4_ref, b4_ref,
                              z_ref, alpha_ref, kl_ref, logpx_ref):
    # v5e (HBM-bound) variant: stream only the raw noise and pay 2 extra in-kernel
    # logs instead of streaming 2 extra f32 pixel planes from HBM.
    x = x_ref[...]
    xn = jnp.clip(x + noise_ref[...], X_MIN, X_MAX)
    _vae_math(x, u_ref[...], jnp.log(xn), jnp.log(1.0 - xn),
              w1_ref[...], b1_ref[...], w2_ref[...], b2_ref[...],
              w3_ref[...], b3_ref[...], w4_ref[...], b4_ref[...],
              z_ref, alpha_ref, kl_ref, logpx_ref)


# -----------------------------------------------------------------------------
# VMEM budgeting / tiling helpers
# -----------------------------------------------------------------------------
def _device_kind():
    try:
        return jax.devices()[0].device_kind.lower()
    except Exception:
        return ""


def _vmem_budget_bytes(kind):
    # Physical VMEM per TensorCore: 128 MiB on v5e/v6e, 64 MiB on v7x.
    if "v7" in kind:
        return 52 * 1024 * 1024
    if "v5" in kind or "v6" in kind:
        return 96 * 1024 * 1024
    return 32 * 1024 * 1024          # unknown generation: stay at the safe default


def _vmem_estimate_bytes(tile_b, D, hp, zp, n_pixel_streams):
    # bf16 weights + f32 biases are single-buffered (pl.Buffered(1), constant index_map).
    weights = 2 * (D * hp + hp * zp + zp * hp + hp * D) + 4 * (2 * hp + zp + D)
    # Row-tiled inputs/outputs are double-buffered by the default pipeline.
    rows_in = 2 * 4 * tile_b * (n_pixel_streams * D + zp)
    rows_out = 2 * 4 * tile_b * (zp + D + 2 * _LANE)
    # Generous bound on live f32 intermediates (h, logits, kl, h2, x_hat, alpha,
    # a, b, lgamma shift products, logpx, ...).
    interm = 4 * tile_b * (10 * D + 4 * hp + 6 * zp)
    return weights + rows_in + rows_out + interm


def _fixed_spec(r, c):
    # Constant index_map => the block is fetched exactly once; requesting a single
    # buffer halves the resident-weight VMEM vs the default double-buffering.
    try:
        return pl.BlockSpec((r, c), lambda i: (0, 0), pipeline_mode=pl.Buffered(1))
    except TypeError:   # older jax without pipeline_mode: fall back to the default
        return pl.BlockSpec((r, c), lambda i: (0, 0))


# -----------------------------------------------------------------------------
# Wrapper: padding, BlockSpecs, pallas_call
# -----------------------------------------------------------------------------
def vae_pallas_forward(x_flat, u, noise_flat, params, *, precompute_pixel_logs=None):
    """Fused forward.  Returns (z, alpha, kl, logpx) at the original shapes."""
    B, D = x_flat.shape
    z_size = params["enc_w2"].shape[1]
    hidden = params["enc_w1"].shape[1]
    # TODO(synk): support pixel dims not divisible by 128 via an in-kernel lane mask.
    assert D % _LANE == 0, "pixel dim (3*H*W) must be lane aligned"

    kind = _device_kind()
    if precompute_pixel_logs is None:
        # v5e is HBM-bandwidth bound -> keep pixel logs in-kernel; v6e/v7x are
        # EUP-bound -> offload them to a mem-bound XLA prologue.
        precompute_pixel_logs = "v5" not in kind

    zp = _round_up(z_size, _LANE)
    hp = _round_up(hidden, _LANE)

    # --- batch tile: fill the MXU (128 rows on v5e, 256 on v6e/v7x) subject to
    # the per-TensorCore VMEM budget.
    n_pixel_streams = 3 if precompute_pixel_logs else 2   # x + (logx,log1mx) | x + noise
    budget = _vmem_budget_bytes(kind)
    mxu_rows = 128 if "v5" in kind else 256
    tile_cap = min(_round_up(B, _SUBLANE), mxu_rows)
    tile_b = _SUBLANE
    for cand in [tile_cap] + [c for c in (256, 128, 64, 32, 16, 8) if c < tile_cap]:
        if _vmem_estimate_bytes(cand, D, hp, zp, n_pixel_streams) <= budget:
            tile_b = cand
            break
    # TODO(synk): if the resident bf16 weights alone exceed the budget (huge D*hp),
    # add a K/N reduction grid axis instead of keeping them whole-block resident.
    b_pad = _round_up(B, tile_b)
    est = _vmem_estimate_bytes(tile_b, D, hp, zp, n_pixel_streams)
    vmem_limit = int(min(max(32 * 1024 * 1024, est * 13 // 10),
                         max(budget, 32 * 1024 * 1024)))

    # Zero padding is mathematically inert: padded hidden units are exactly 0
    # after leaky_relu; padded latents get logits 0 (q = 0.5 -> KL term 0) and
    # their dec_w1 rows are 0 so they never reach the decoder.
    def pad2(arr, rows, cols):
        return jnp.pad(arr, ((0, rows - arr.shape[0]), (0, cols - arr.shape[1])))

    w1 = pad2(params["enc_w1"], D, hp).astype(jnp.bfloat16)
    b1 = pad2(params["enc_b1"], 1, hp)
    w2 = pad2(params["enc_w2"], hp, zp).astype(jnp.bfloat16)
    b2 = pad2(params["enc_b2"], 1, zp)
    w3 = pad2(params["dec_w1"], zp, hp).astype(jnp.bfloat16)
    b3 = pad2(params["dec_b1"], 1, hp)
    w4 = pad2(params["dec_w2"], hp, D).astype(jnp.bfloat16)
    b4 = pad2(params["dec_b2"], 1, D)

    x_p = pad2(x_flat, b_pad, D)
    u_p = jnp.pad(u, ((0, b_pad - B), (0, zp - z_size)), constant_values=2.0)

    if precompute_pixel_logs:
        xn = jnp.clip(x_flat + noise_flat, X_MIN, X_MAX)
        pixel_arrays = (pad2(jnp.log(xn), b_pad, D),
                        pad2(jnp.log(1.0 - xn), b_pad, D))
        kernel = _vae_kernel_precomputed
    else:
        pixel_arrays = (pad2(noise_flat, b_pad, D),)
        kernel = _vae_kernel_inkernel_logs

    grid = (b_pad // tile_b,)
    row = lambda d: pl.BlockSpec((tile_b, d), lambda i: (i, 0))        # batch-tiled

    in_specs = ([row(D), row(zp)] + [row(D)] * len(pixel_arrays) +
                [_fixed_spec(D, hp), _fixed_spec(1, hp),
                 _fixed_spec(hp, zp), _fixed_spec(1, zp),
                 _fixed_spec(zp, hp), _fixed_spec(1, hp),
                 _fixed_spec(hp, D), _fixed_spec(1, D)])

    flops = 2 * b_pad * (D * hp + hp * zp + zp * hp + hp * D)
    logs_px = 3 if precompute_pixel_logs else 5
    transcendentals = b_pad * ((logs_px + 3) * D + 4 * zp)
    bytes_accessed = (4 * b_pad * ((1 + len(pixel_arrays)) * D + zp)
                      + 2 * (w1.size + w2.size + w3.size + w4.size)
                      + 4 * (b1.size + b2.size + b3.size + b4.size)
                      + 4 * b_pad * (zp + D + 2 * _LANE))

    z_p, alpha_p, kl_p, logpx_p = pl.pallas_call(
        kernel,
        grid=grid,
        in_specs=in_specs,
        out_specs=(row(zp), row(D), row(_LANE), row(_LANE)),
        out_shape=(jax.ShapeDtypeStruct((b_pad, zp), jnp.float32),
                   jax.ShapeDtypeStruct((b_pad, D), jnp.float32),
                   jax.ShapeDtypeStruct((b_pad, _LANE), jnp.float32),
                   jax.ShapeDtypeStruct((b_pad, _LANE), jnp.float32)),
        compiler_params=pltpu.CompilerParams(
            dimension_semantics=("parallel",),
            vmem_limit_bytes=vmem_limit),
        cost_estimate=pl.CostEstimate(flops=flops,
                                      transcendentals=transcendentals,
                                      bytes_accessed=bytes_accessed),
    )(x_p, u_p, *pixel_arrays, w1, b1, w2, b2, w3, b3, w4, b4)

    z = z_p[:B, :z_size]
    alpha = alpha_p[:B, :]
    kl = kl_p[:B, 0]
    logpx = logpx_p[:B, 0]
    return z, alpha, kl, logpx


def vae_forward(x, params, bern_u, dequant_noise, warmup=1.0, *,
                precompute_pixel_logs=None):
    """Mirrors VAE.forward.  x is NCHW (B, 3, H, W) in [0, 1)."""
    B, C, H, W = x.shape
    x_flat = x.reshape(B, C * H * W)
    noise_flat = dequant_noise.reshape(B, C * H * W)

    z, alpha, kl, logpx = vae_pallas_forward(
        x_flat, bern_u, noise_flat, params,
        precompute_pixel_logs=precompute_pixel_logs)

    log_ws = logpx - kl
    return {
        "logpx": jnp.mean(logpx),
        "x_recon": alpha.reshape(B, C, H, W),
        "welbo": jnp.mean(logpx + warmup * kl),
        "elbo": jnp.mean(log_ws),
        "logws": log_ws,
        "z": z,
        "logpz": jnp.zeros((1,), jnp.float32),
        "logqz": jnp.mean(kl),
    }


# -----------------------------------------------------------------------------
# Pure-JAX f32 reference (sanity check of the kernel math)
# -----------------------------------------------------------------------------
def vae_forward_ref(x, params, bern_u, dequant_noise, z_override=None):
    B = x.shape[0]
    xf = x.reshape(B, -1)
    hprec = jax.lax.Precision.HIGHEST
    h = jax.nn.leaky_relu(jnp.dot(xf, params["enc_w1"], precision=hprec)
                          + params["enc_b1"], LEAKY_SLOPE)
    logits = jnp.dot(h, params["enc_w2"], precision=hprec) + params["enc_b2"]
    q = jax.nn.sigmoid(logits)
    z = (bern_u < q).astype(jnp.float32)
    z_used = z if z_override is None else z_override
    h2 = jax.nn.leaky_relu(jnp.dot(z_used, params["dec_w1"], precision=hprec)
                           + params["dec_b1"], LEAKY_SLOPE)
    x_hat = jnp.dot(h2, params["dec_w2"], precision=hprec) + params["dec_b2"]

    qc = jnp.clip(q, PROB_MIN, PROB_MAX)
    kl = jnp.sum(qc * jnp.log(qc / 0.5) + (1 - qc) * jnp.log((1 - qc) / 0.5), axis=1)
    alpha = jax.nn.sigmoid(x_hat)
    a, b = alpha * BETA_SCALE, (1.0 - alpha) * BETA_SCALE
    xn = jnp.clip(xf + dequant_noise.reshape(B, -1), X_MIN, X_MAX)
    lg = jax.scipy.special.gammaln
    logpx = jnp.sum((a - 1.0) * jnp.log(xn) + (b - 1.0) * jnp.log(1.0 - xn)
                    - lg(a) - lg(b) + lg(a + b), axis=1)
    return {"logits": logits, "q": q, "z": z, "kl": kl, "alpha": alpha, "logpx": logpx}


def init_params(key, d_in, hidden, z_size):
    ks = jax.random.split(key, 4)
    s = 0.05
    return {
        "enc_w1": jax.random.normal(ks[0], (d_in, hidden), jnp.float32) * s,
        "enc_b1": jnp.zeros((1, hidden), jnp.float32),
        "enc_w2": jax.random.normal(ks[1], (hidden, z_size), jnp.float32) * s,
        "enc_b2": jnp.zeros((1, z_size), jnp.float32),
        "dec_w1": jax.random.normal(ks[2], (z_size, hidden), jnp.float32) * s,
        "dec_b1": jnp.zeros((1, hidden), jnp.float32),
        "dec_w2": jax.random.normal(ks[3], (hidden, d_in), jnp.float32) * s,
        "dec_b2": jnp.zeros((1, d_in), jnp.float32),
    }


if __name__ == "__main__":
    # Small deterministic config: B=2, 3x16x16 images, z_size=32, hidden=64
    # (padded to 128/128 lane widths inside the wrapper).
    B, C, H, W = 2, 3, 16, 16
    z_size, hidden = 32, 64
    d_in = C * H * W

    key = jax.random.PRNGKey(0)
    k_x, k_u, k_n, k_p = jax.random.split(key, 4)

    x = jax.random.uniform(k_x, (B, C, H, W), jnp.float32, 0.0, 1.0)
    bern_u = jax.random.uniform(k_u, (B, z_size), jnp.float32)           # Bernoulli noise
    dequant = jax.random.uniform(k_n, (B, C, H, W), jnp.float32, 0.0, 1.0 / 256.0)
    params = init_params(k_p, d_in, hidden, z_size)

    ref = vae_forward_ref(x, params, bern_u, dequant)

    # Exercise BOTH pixel-log paths (v6e/v7x-style precompute and v5e-style
    # in-kernel logs) so whichever generation we run on is covered.
    for precompute in (True, False):
        fwd = jax.jit(partial(vae_forward, precompute_pixel_logs=precompute))
        out = fwd(x, params, bern_u, dequant)
        out = jax.tree_util.tree_map(jax.block_until_ready, out)

        # The kernel's matmuls run in bf16, so a hard Bernoulli sample may only
        # legitimately flip when u lies within bf16 noise of the sigmoid threshold.
        z_k = np.asarray(out["z"])
        z_r = np.asarray(ref["z"])
        near_thresh = np.abs(np.asarray(bern_u) - np.asarray(ref["q"])) < 2e-2
        assert np.all((z_k == z_r) | near_thresh), "z sample mismatch away from threshold"

        # Decoder-side quantities compared against a reference driven by the
        # kernel's own z (removes sensitivity to any threshold flip).
        ref_dec = vae_forward_ref(x, params, bern_u, dequant, z_override=out["z"])

        np.testing.assert_allclose(float(out["logqz"]), float(ref["kl"].mean()),
                                   rtol=2e-2, atol=1e-2)
        np.testing.assert_allclose(float(out["logpx"]), float(ref_dec["logpx"].mean()),
                                   rtol=2e-2, atol=1.0)
        elbo_ref = float((ref_dec["logpx"] - ref["kl"]).mean())
        np.testing.assert_allclose(float(out["elbo"]), elbo_ref, rtol=2e-2, atol=1.0)
        np.testing.assert_allclose(np.asarray(out["x_recon"]).reshape(B, -1),
                                   np.asarray(ref_dec["alpha"]), atol=5e-3)
        assert out["x_recon"].shape == (B, C, H, W)
        assert out["logws"].shape == (B,)
        assert out["z"].shape == (B, z_size)

    print("KERNEL_OK")
</pallas_src>

<mosaic_0001>
module attributes {stable_mosaic.version = 11 : i64} {
  func.func @_vae_kernel_precomputed(%arg0: i32, %arg1: memref<8x768xf32, #tpu.memory_space<vmem>>, %arg2: memref<8x128xf32, #tpu.memory_space<vmem>>, %arg3: memref<8x768xf32, #tpu.memory_space<vmem>>, %arg4: memref<8x768xf32, #tpu.memory_space<vmem>>, %arg5: memref<768x128xbf16, #tpu.memory_space<vmem>>, %arg6: memref<1x128xf32, #tpu.memory_space<vmem>>, %arg7: memref<128x128xbf16, #tpu.memory_space<vmem>>, %arg8: memref<1x128xf32, #tpu.memory_space<vmem>>, %arg9: memref<128x128xbf16, #tpu.memory_space<vmem>>, %arg10: memref<1x128xf32, #tpu.memory_space<vmem>>, %arg11: memref<128x768xbf16, #tpu.memory_space<vmem>>, %arg12: memref<1x768xf32, #tpu.memory_space<vmem>>, %arg13: memref<8x128xf32, #tpu.memory_space<vmem>>, %arg14: memref<8x768xf32, #tpu.memory_space<vmem>>, %arg15: memref<8x128xf32, #tpu.memory_space<vmem>>, %arg16: memref<8x128xf32, #tpu.memory_space<vmem>>) attributes {dimension_semantics = [#tpu.dimension_semantics<parallel>], iteration_bounds = array<i64: 1>, scalar_prefetch = 0 : i64, scratch_operands = 0 : i64, tpu.core_type = #tpu.core_type<tc>, window_params = [{transform_indices = @transform_0, window_bounds = array<i64: 8, 768>}, {transform_indices = @transform_1, window_bounds = array<i64: 8, 128>}, {transform_indices = @transform_2, window_bounds = array<i64: 8, 768>}, {transform_indices = @transform_3, window_bounds = array<i64: 8, 768>}, {pipeline_mode = #tpu.pipeline_mode<synchronous>, transform_indices = @transform_4, window_bounds = array<i64: 768, 128>}, {pipeline_mode = #tpu.pipeline_mode<synchronous>, transform_indices = @transform_5, window_bounds = array<i64: 1, 128>}, {pipeline_mode = #tpu.pipeline_mode<synchronous>, transform_indices = @transform_6, window_bounds = array<i64: 128, 128>}, {pipeline_mode = #tpu.pipeline_mode<synchronous>, transform_indices = @transform_7, window_bounds = array<i64: 1, 128>}, {pipeline_mode = #tpu.pipeline_mode<synchronous>, transform_indices = @transform_8, window_bounds = array<i64: 128, 128>}, {pipeline_mode = #tpu.pipeline_mode<synchronous>, transform_indices = @transform_9, window_bounds = array<i64: 1, 128>}, {pipeline_mode = #tpu.pipeline_mode<synchronous>, transform_indices = @transform_10, window_bounds = array<i64: 128, 768>}, {pipeline_mode = #tpu.pipeline_mode<synchronous>, transform_indices = @transform_11, window_bounds = array<i64: 1, 768>}, {transform_indices = @transform_12, window_bounds = array<i64: 8, 128>}, {transform_indices = @transform_13, window_bounds = array<i64: 8, 768>}, {transform_indices = @transform_14, window_bounds = array<i64: 8, 128>}, {transform_indices = @transform_15, window_bounds = array<i64: 8, 128>}]} {
    %c0 = arith.constant 0 : index
    %c0_0 = arith.constant 0 : index
    %0 = vector.load %arg1[%c0, %c0_0] : memref<8x768xf32, #tpu.memory_space<vmem>>, vector<8x768xf32>
    %c0_1 = arith.constant 0 : index
    %c0_2 = arith.constant 0 : index
    %1 = vector.load %arg2[%c0_1, %c0_2] : memref<8x128xf32, #tpu.memory_space<vmem>>, vector<8x128xf32>
    %c0_3 = arith.constant 0 : index
    %c0_4 = arith.constant 0 : index
    %2 = vector.load %arg3[%c0_3, %c0_4] : memref<8x768xf32, #tpu.memory_space<vmem>>, vector<8x768xf32>
    %c0_5 = arith.constant 0 : index
    %c0_6 = arith.constant 0 : index
    %3 = vector.load %arg4[%c0_5, %c0_6] : memref<8x768xf32, #tpu.memory_space<vmem>>, vector<8x768xf32>
    %c0_7 = arith.constant 0 : index
    %c0_8 = arith.constant 0 : index
    %4 = vector.load %arg5[%c0_7, %c0_8] : memref<768x128xbf16, #tpu.memory_space<vmem>>, vector<768x128xbf16>
    %c0_9 = arith.constant 0 : index
    %c0_10 = arith.constant 0 : index
    %5 = vector.load %arg6[%c0_9, %c0_10] : memref<1x128xf32, #tpu.memory_space<vmem>>, vector<1x128xf32>
    %c0_11 = arith.constant 0 : index
    %c0_12 = arith.constant 0 : index
    %6 = vector.load %arg7[%c0_11, %c0_12] : memref<128x128xbf16, #tpu.memory_space<vmem>>, vector<128x128xbf16>
    %c0_13 = arith.constant 0 : index
    %c0_14 = arith.constant 0 : index
    %7 = vector.load %arg8[%c0_13, %c0_14] : memref<1x128xf32, #tpu.memory_space<vmem>>, vector<1x128xf32>
    %c0_15 = arith.constant 0 : index
    %c0_16 = arith.constant 0 : index
    %8 = vector.load %arg9[%c0_15, %c0_16] : memref<128x128xbf16, #tpu.memory_space<vmem>>, vector<128x128xbf16>
    %c0_17 = arith.constant 0 : index
    %c0_18 = arith.constant 0 : index
    %9 = vector.load %arg10[%c0_17, %c0_18] : memref<1x128xf32, #tpu.memory_space<vmem>>, vector<1x128xf32>
    %c0_19 = arith.constant 0 : index
    %c0_20 = arith.constant 0 : index
    %10 = vector.load %arg11[%c0_19, %c0_20] : memref<128x768xbf16, #tpu.memory_space<vmem>>, vector<128x768xbf16>
    %c0_21 = arith.constant 0 : index
    %c0_22 = arith.constant 0 : index
    %11 = vector.load %arg12[%c0_21, %c0_22] : memref<1x768xf32, #tpu.memory_space<vmem>>, vector<1x768xf32>
    %12 = arith.truncf %0 : vector<8x768xf32> to vector<8x768xbf16>
    %cst = arith.constant dense<0.000000e+00> : vector<8x128xf32>
    %13 = tpu.matmul %12, %4, %cst {dimension_numbers = #tpu.dot_dimension_numbers<[1], [0], [0], [1], [0, 0, 1, 1], [], []>} : vector<8x768xbf16>, vector<768x128xbf16>, vector<8x128xf32> -> vector<8x128xf32>
    %14 = vector.broadcast %5 : vector<1x128xf32> to vector<8x128xf32>
    %15 = arith.addf %13, %14 : vector<8x128xf32>
    %cst_23 = arith.constant 0.000000e+00 : f32
    %16 = vector.broadcast %cst_23 : f32 to vector<8x128xf32>
    %17 = arith.cmpf ogt, %15, %16 : vector<8x128xf32>
    %cst_24 = arith.constant 0.00999999977 : f32
    %18 = vector.broadcast %cst_24 : f32 to vector<8x128xf32>
    %19 = arith.mulf %18, %15 : vector<8x128xf32>
    %20 = arith.select %17, %15, %19 : vector<8x128xi1>, vector<8x128xf32>
    %21 = arith.truncf %20 : vector<8x128xf32> to vector<8x128xbf16>
    %cst_25 = arith.constant dense<0.000000e+00> : vector<8x128xf32>
    %22 = tpu.matmul %21, %6, %cst_25 {dimension_numbers = #tpu.dot_dimension_numbers<[1], [0], [0], [1], [0, 0, 1, 1], [], []>} : vector<8x128xbf16>, vector<128x128xbf16>, vector<8x128xf32> -> vector<8x128xf32>
    %23 = vector.broadcast %7 : vector<1x128xf32> to vector<8x128xf32>
    %24 = arith.addf %22, %23 : vector<8x128xf32>
    %25 = math.absf %24 : vector<8x128xf32>
    %cst_26 = arith.constant 0.000000e+00 : f32
    %26 = vector.broadcast %cst_26 : f32 to vector<8x128xf32>
    %27 = arith.subf %26, %25 : vector<8x128xf32>
    %28 = math.exp %27 : vector<8x128xf32>
    %cst_27 = arith.constant 1.000000e+00 : f32
    %29 = vector.broadcast %cst_27 : f32 to vector<8x128xf32>
    %30 = arith.addf %29, %28 : vector<8x128xf32>
    %cst_28 = arith.constant 1.000000e+00 : f32
    %31 = vector.broadcast %cst_28 : f32 to vector<8x128xf32>
    %32 = arith.divf %31, %30 : vector<8x128xf32>
    %cst_29 = arith.constant 0.000000e+00 : f32
    %33 = vector.broadcast %cst_29 : f32 to vector<8x128xf32>
    %34 = arith.cmpf oge, %24, %33 : vector<8x128xf32>
    %35 = arith.mulf %28, %32 : vector<8x128xf32>
    %36 = arith.select %34, %32, %35 : vector<8x128xi1>, vector<8x128xf32>
    %37 = arith.cmpf olt, %1, %36 : vector<8x128xf32>
    %38 = arith.extui %37 : vector<8x128xi1> to vector<8x128xi32>
    %39 = arith.sitofp %38 : vector<8x128xi32> to vector<8x128xf32>
    %c0_30 = arith.constant 0 : index
    %c0_31 = arith.constant 0 : index
    %40 = vector.load %arg13[%c0_30, %c0_31] : memref<8x128xf32, #tpu.memory_space<vmem>>, vector<8x128xf32>
    tpu.vector_store %arg13[%c0_30, %c0_31], %39 {strides = array<i32>} : memref<8x128xf32, #tpu.memory_space<vmem>>, vector<8x128xf32>,
    %cst_32 = arith.constant 1.000000e+00 : f32
    %41 = vector.broadcast %cst_32 : f32 to vector<8x128xf32>
    %42 = arith.addf %41, %28 : vector<8x128xf32>
    %43 = math.log %42 : vector<8x128xf32>
    %cst_33 = arith.constant 0.000000e+00 : f32
    %44 = vector.broadcast %cst_33 : f32 to vector<8x128xf32>
    %45 = arith.subf %44, %24 : vector<8x128xf32>
    %cst_34 = arith.constant 0.000000e+00 : f32
    %46 = vector.broadcast %cst_34 : f32 to vector<8x128xf32>
    %47 = arith.maximumf %45, %46 : vector<8x128xf32>
    %48 = arith.addf %43, %47 : vector<8x128xf32>
    %49 = arith.addf %48, %24 : vector<8x128xf32>
    %cst_35 = arith.constant 0.000000e+00 : f32
    %50 = vector.broadcast %cst_35 : f32 to vector<8x128xf32>
    %51 = arith.subf %50, %48 : vector<8x128xf32>
    %52 = arith.mulf %36, %51 : vector<8x128xf32>
    %cst_36 = arith.constant 1.000000e+00 : f32
    %53 = vector.broadcast %cst_36 : f32 to vector<8x128xf32>
    %54 = arith.subf %53, %36 : vector<8x128xf32>
    %cst_37 = arith.constant 0.000000e+00 : f32
    %55 = vector.broadcast %cst_37 : f32 to vector<8x128xf32>
    %56 = arith.subf %55, %49 : vector<8x128xf32>
    %57 = arith.mulf %54, %56 : vector<8x128xf32>
    %58 = arith.addf %52, %57 : vector<8x128xf32>
    %cst_38 = arith.constant 0.693147182 : f32
    %59 = vector.broadcast %cst_38 : f32 to vector<8x128xf32>
    %60 = arith.addf %58, %59 : vector<8x128xf32>
    %cst_39 = arith.constant dense<0.000000e+00> : vector<8xf32>
    %61 = vector.multi_reduction <add>, %60, %cst_39 [1] : vector<8x128xf32> to vector<8xf32>
    %62 = vector.shape_cast %61 : vector<8xf32> to vector<8x1xf32>
    %63 = vector.shape_cast %62 : vector<8x1xf32> to vector<8x1xf32>
    %64 = vector.broadcast %63 : vector<8x1xf32> to vector<8x128xf32>
    %c0_40 = arith.constant 0 : index
    %c0_41 = arith.constant 0 : index
    %65 = vector.load %arg15[%c0_40, %c0_41] : memref<8x128xf32, #tpu.memory_space<vmem>>, vector<8x128xf32>
    tpu.vector_store %arg15[%c0_40, %c0_41], %64 {strides = array<i32>} : memref<8x128xf32, #tpu.memory_space<vmem>>, vector<8x128xf32>,
    %66 = arith.truncf %39 : vector<8x128xf32> to vector<8x128xbf16>
    %cst_42 = arith.constant dense<0.000000e+00> : vector<8x128xf32>
    %67 = tpu.matmul %66, %8, %cst_42 {dimension_numbers = #tpu.dot_dimension_numbers<[1], [0], [0], [1], [0, 0, 1, 1], [], []>} : vector<8x128xbf16>, vector<128x128xbf16>, vector<8x128xf32> -> vector<8x128xf32>
    %68 = vector.broadcast %9 : vector<1x128xf32> to vector<8x128xf32>
    %69 = arith.addf %67, %68 : vector<8x128xf32>
    %cst_43 = arith.constant 0.000000e+00 : f32
    %70 = vector.broadcast %cst_43 : f32 to vector<8x128xf32>
    %71 = arith.cmpf ogt, %69, %70 : vector<8x128xf32>
    %cst_44 = arith.constant 0.00999999977 : f32
    %72 = vector.broadcast %cst_44 : f32 to vector<8x128xf32>
    %73 = arith.mulf %72, %69 : vector<8x128xf32>
    %74 = arith.select %71, %69, %73 : vector<8x128xi1>, vector<8x128xf32>
    %75 = arith.truncf %74 : vector<8x128xf32> to vector<8x128xbf16>
    %cst_45 = arith.constant dense<0.000000e+00> : vector<8x768xf32>
    %76 = tpu.matmul %75, %10, %cst_45 {dimension_numbers = #tpu.dot_dimension_numbers<[1], [0], [0], [1], [0, 0, 1, 1], [], []>} : vector<8x128xbf16>, vector<128x768xbf16>, vector<8x768xf32> -> vector<8x768xf32>
    %77 = vector.broadcast %11 : vector<1x768xf32> to vector<8x768xf32>
    %78 = arith.addf %76, %77 : vector<8x768xf32>
    %79 = math.absf %78 : vector<8x768xf32>
    %cst_46 = arith.constant 0.000000e+00 : f32
    %80 = vector.broadcast %cst_46 : f32 to vector<8x768xf32>
    %81 = arith.subf %80, %79 : vector<8x768xf32>
    %82 = math.exp %81 : vector<8x768xf32>
    %cst_47 = arith.constant 1.000000e+00 : f32
    %83 = vector.broadcast %cst_47 : f32 to vector<8x768xf32>
    %84 = arith.addf %83, %82 : vector<8x768xf32>
    %cst_48 = arith.constant 1.000000e+00 : f32
    %85 = vector.broadcast %cst_48 : f32 to vector<8x768xf32>
    %86 = arith.divf %85, %84 : vector<8x768xf32>
    %cst_49 = arith.constant 0.000000e+00 : f32
    %87 = vector.broadcast %cst_49 : f32 to vector<8x768xf32>
    %88 = arith.cmpf oge, %78, %87 : vector<8x768xf32>
    %89 = arith.mulf %82, %86 : vector<8x768xf32>
    %90 = arith.select %88, %86, %89 : vector<8x768xi1>, vector<8x768xf32>
    %cst_50 = arith.constant 0.000000e+00 : f32
    %91 = vector.broadcast %cst_50 : f32 to vector<8x768xf32>
    %92 = arith.cmpf oge, %78, %91 : vector<8x768xf32>
    %93 = arith.mulf %82, %86 : vector<8x768xf32>
    %94 = arith.select %92, %93, %86 : vector<8x768xi1>, vector<8x768xf32>
    %c0_51 = arith.constant 0 : index
    %c0_52 = arith.constant 0 : index
    %95 = vector.load %arg14[%c0_51, %c0_52] : memref<8x768xf32, #tpu.memory_space<vmem>>, vector<8x768xf32>
    tpu.vector_store %arg14[%c0_51, %c0_52], %90 {strides = array<i32>} : memref<8x768xf32, #tpu.memory_space<vmem>>, vector<8x768xf32>,
    %cst_53 = arith.constant 9.99999993E-9 : f32
    %96 = vector.broadcast %cst_53 : f32 to vector<8x768xf32>
    %97 = arith.maximumf %90, %96 : vector<8x768xf32>
    %cst_54 = arith.constant 1.000000e+02 : f32
    %98 = vector.broadcast %cst_54 : f32 to vector<8x768xf32>
    %99 = arith.mulf %98, %97 : vector<8x768xf32>
    %cst_55 = arith.constant 1.000000e-07 : f32
    %100 = vector.broadcast %cst_55 : f32 to vector<8x768xf32>
    %101 = arith.maximumf %94, %100 : vector<8x768xf32>
    %cst_56 = arith.constant 1.000000e+02 : f32
    %102 = vector.broadcast %cst_56 : f32 to vector<8x768xf32>
    %103 = arith.mulf %102, %101 : vector<8x768xf32>
    %cst_57 = arith.constant 1.000000e+00 : f32
    %104 = vector.broadcast %cst_57 : f32 to vector<8x768xf32>
    %105 = arith.subf %99, %104 : vector<8x768xf32>
    %106 = arith.mulf %105, %2 : vector<8x768xf32>
    %cst_58 = arith.constant 1.000000e+00 : f32
    %107 = vector.broadcast %cst_58 : f32 to vector<8x768xf32>
    %108 = arith.subf %103, %107 : vector<8x768xf32>
    %109 = arith.mulf %108, %3 : vector<8x768xf32>
    %110 = arith.addf %106, %109 : vector<8x768xf32>
    %cst_59 = arith.constant 1.000000e+00 : f32
    %111 = vector.broadcast %cst_59 : f32 to vector<8x768xf32>
    %112 = arith.addf %99, %111 : vector<8x768xf32>
    %113 = arith.mulf %99, %112 : vector<8x768xf32>
    %cst_60 = arith.constant 1.000000e+00 : f32
    %114 = vector.broadcast %cst_60 : f32 to vector<8x768xf32>
    %115 = arith.addf %103, %114 : vector<8x768xf32>
    %116 = arith.mulf %103, %115 : vector<8x768xf32>
    %cst_61 = arith.constant 1.000000e+00 : f32
    %117 = vector.broadcast %cst_61 : f32 to vector<8x768xf32>
    %118 = arith.addf %112, %117 : vector<8x768xf32>
    %119 = arith.mulf %113, %118 : vector<8x768xf32>
    %cst_62 = arith.constant 1.000000e+00 : f32
    %120 = vector.broadcast %cst_62 : f32 to vector<8x768xf32>
    %121 = arith.addf %115, %120 : vector<8x768xf32>
    %122 = arith.mulf %116, %121 : vector<8x768xf32>
    %cst_63 = arith.constant 1.000000e+00 : f32
    %123 = vector.broadcast %cst_63 : f32 to vector<8x768xf32>
    %124 = arith.addf %118, %123 : vector<8x768xf32>
    %125 = arith.mulf %119, %124 : vector<8x768xf32>
    %cst_64 = arith.constant 1.000000e+00 : f32
    %126 = vector.broadcast %cst_64 : f32 to vector<8x768xf32>
    %127 = arith.addf %121, %126 : vector<8x768xf32>
    %128 = arith.mulf %122, %127 : vector<8x768xf32>
    %cst_65 = arith.constant 1.000000e+00 : f32
    %129 = vector.broadcast %cst_65 : f32 to vector<8x768xf32>
    %130 = arith.addf %124, %129 : vector<8x768xf32>
    %131 = arith.mulf %125, %130 : vector<8x768xf32>
    %cst_66 = arith.constant 1.000000e+00 : f32
    %132 = vector.broadcast %cst_66 : f32 to vector<8x768xf32>
    %133 = arith.addf %127, %132 : vector<8x768xf32>
    %134 = arith.mulf %128, %133 : vector<8x768xf32>
    %cst_67 = arith.constant 1.000000e+00 : f32
    %135 = vector.broadcast %cst_67 : f32 to vector<8x768xf32>
    %136 = arith.addf %130, %135 : vector<8x768xf32>
    %137 = arith.mulf %131, %136 : vector<8x768xf32>
    %cst_68 = arith.constant 1.000000e+00 : f32
    %138 = vector.broadcast %cst_68 : f32 to vector<8x768xf32>
    %139 = arith.addf %133, %138 : vector<8x768xf32>
    %140 = arith.mulf %134, %139 : vector<8x768xf32>
    %cst_69 = arith.constant 1.000000e+00 : f32
    %141 = vector.broadcast %cst_69 : f32 to vector<8x768xf32>
    %142 = arith.addf %136, %141 : vector<8x768xf32>
    %143 = arith.mulf %137, %142 : vector<8x768xf32>
    %cst_70 = arith.constant 1.000000e+00 : f32
    %144 = vector.broadcast %cst_70 : f32 to vector<8x768xf32>
    %145 = arith.addf %139, %144 : vector<8x768xf32>
    %146 = arith.mulf %140, %145 : vector<8x768xf32>
    %cst_71 = arith.constant 1.000000e+00 : f32
    %147 = vector.broadcast %cst_71 : f32 to vector<8x768xf32>
    %148 = arith.addf %142, %147 : vector<8x768xf32>
    %149 = arith.mulf %143, %148 : vector<8x768xf32>
    %cst_72 = arith.constant 1.000000e+00 : f32
    %150 = vector.broadcast %cst_72 : f32 to vector<8x768xf32>
    %151 = arith.addf %145, %150 : vector<8x768xf32>
    %152 = arith.mulf %146, %151 : vector<8x768xf32>
    %cst_73 = arith.constant 1.000000e+00 : f32
    %153 = vector.broadcast %cst_73 : f32 to vector<8x768xf32>
    %154 = arith.addf %148, %153 : vector<8x768xf32>
    %cst_74 = arith.constant 1.000000e+00 : f32
    %155 = vector.broadcast %cst_74 : f32 to vector<8x768xf32>
    %156 = arith.addf %151, %155 : vector<8x768xf32>
    %157 = tpu.reciprocal %154 {approx = true} : vector<8x768xf32> -> vector<8x768xf32>
    %158 = tpu.reciprocal %156 {approx = true} : vector<8x768xf32> -> vector<8x768xf32>
    %159 = arith.mulf %157, %157 : vector<8x768xf32>
    %160 = arith.mulf %158, %158 : vector<8x768xf32>
    %cst_75 = arith.constant 7.93650805E-4 : f32
    %161 = vector.broadcast %cst_75 : f32 to vector<8x768xf32>
    %162 = arith.mulf %159, %161 : vector<8x768xf32>
    %cst_76 = arith.constant 0.00277777785 : f32
    %163 = vector.broadcast %cst_76 : f32 to vector<8x768xf32>
    %164 = arith.subf %163, %162 : vector<8x768xf32>
    %165 = arith.mulf %159, %164 : vector<8x768xf32>
    %cst_77 = arith.constant 0.0833333358 : f32
    %166 = vector.broadcast %cst_77 : f32 to vector<8x768xf32>
    %167 = arith.subf %166, %165 : vector<8x768xf32>
    %168 = arith.mulf %157, %167 : vector<8x768xf32>
    %cst_78 = arith.constant 7.93650805E-4 : f32
    %169 = vector.broadcast %cst_78 : f32 to vector<8x768xf32>
    %170 = arith.mulf %160, %169 : vector<8x768xf32>
    %cst_79 = arith.constant 0.00277777785 : f32
    %171 = vector.broadcast %cst_79 : f32 to vector<8x768xf32>
    %172 = arith.subf %171, %170 : vector<8x768xf32>
    %173 = arith.mulf %160, %172 : vector<8x768xf32>
    %cst_80 = arith.constant 0.0833333358 : f32
    %174 = vector.broadcast %cst_80 : f32 to vector<8x768xf32>
    %175 = arith.subf %174, %173 : vector<8x768xf32>
    %176 = arith.mulf %158, %175 : vector<8x768xf32>
    %177 = arith.addf %168, %176 : vector<8x768xf32>
    %cst_81 = arith.constant 5.000000e-01 : f32
    %178 = vector.broadcast %cst_81 : f32 to vector<8x768xf32>
    %179 = arith.subf %154, %178 : vector<8x768xf32>
    %180 = math.log %154 : vector<8x768xf32>
    %181 = arith.mulf %179, %180 : vector<8x768xf32>
    %cst_82 = arith.constant 5.000000e-01 : f32
    %182 = vector.broadcast %cst_82 : f32 to vector<8x768xf32>
    %183 = arith.subf %156, %182 : vector<8x768xf32>
    %184 = math.log %156 : vector<8x768xf32>
    %185 = arith.mulf %183, %184 : vector<8x768xf32>
    %186 = arith.addf %181, %185 : vector<8x768xf32>
    %187 = arith.subf %186, %154 : vector<8x768xf32>
    %188 = arith.subf %187, %156 : vector<8x768xf32>
    %cst_83 = arith.constant 1.83787704 : f32
    %189 = vector.broadcast %cst_83 : f32 to vector<8x768xf32>
    %190 = arith.addf %188, %189 : vector<8x768xf32>
    %191 = arith.addf %190, %177 : vector<8x768xf32>
    %192 = arith.mulf %149, %152 : vector<8x768xf32>
    %193 = math.log %192 : vector<8x768xf32>
    %194 = arith.subf %191, %193 : vector<8x768xf32>
    %195 = arith.subf %110, %194 : vector<8x768xf32>
    %cst_84 = arith.constant dense<0.000000e+00> : vector<8xf32>
    %196 = vector.multi_reduction <add>, %195, %cst_84 [1] : vector<8x768xf32> to vector<8xf32>
    %197 = vector.shape_cast %196 : vector<8xf32> to vector<8x1xf32>
    %cst_85 = arith.constant 275815.063 : f32
    %198 = vector.broadcast %cst_85 : f32 to vector<8x1xf32>
    %199 = arith.addf %197, %198 : vector<8x1xf32>
    %200 = vector.shape_cast %199 : vector<8x1xf32> to vector<8x1xf32>
    %201 = vector.broadcast %200 : vector<8x1xf32> to vector<8x128xf32>
    %c0_86 = arith.constant 0 : index
    %c0_87 = arith.constant 0 : index
    %202 = vector.load %arg16[%c0_86, %c0_87] : memref<8x128xf32, #tpu.memory_space<vmem>>, vector<8x128xf32>
    tpu.vector_store %arg16[%c0_86, %c0_87], %201 {strides = array<i32>} : memref<8x128xf32, #tpu.memory_space<vmem>>, vector<8x128xf32>,
    return
  }
  func.func @transform_0(%arg0: i32) -> (i32, i32) {
    %c0_i32 = arith.constant 0 : i32
    %c0_i32_0 = arith.constant 0 : i32
    return %arg0, %c0_i32 : i32, i32
  }
  func.func @transform_1(%arg0: i32) -> (i32, i32) {
    %c0_i32 = arith.constant 0 : i32
    %c0_i32_0 = arith.constant 0 : i32
    return %arg0, %c0_i32 : i32, i32
  }
  func.func @transform_2(%arg0: i32) -> (i32, i32) {
    %c0_i32 = arith.constant 0 : i32
    %c0_i32_0 = arith.constant 0 : i32
    return %arg0, %c0_i32 : i32, i32
  }
  func.func @transform_3(%arg0: i32) -> (i32, i32) {
    %c0_i32 = arith.constant 0 : i32
    %c0_i32_0 = arith.constant 0 : i32
    return %arg0, %c0_i32 : i32, i32
  }
  func.func @transform_4(%arg0: i32) -> (i32, i32) {
    %c0_i32 = arith.constant 0 : i32
    %c0_i32_0 = arith.constant 0 : i32
    %c0_i32_1 = arith.constant 0 : i32
    return %c0_i32, %c0_i32_0 : i32, i32
  }
  func.func @transform_5(%arg0: i32) -> (i32, i32) {
    %c0_i32 = arith.constant 0 : i32
    %c0_i32_0 = arith.constant 0 : i32
    %c0_i32_1 = arith.constant 0 : i32
    return %c0_i32, %c0_i32_0 : i32, i32
  }
  func.func @transform_6(%arg0: i32) -> (i32, i32) {
    %c0_i32 = arith.constant 0 : i32
    %c0_i32_0 = arith.constant 0 : i32
    %c0_i32_1 = arith.constant 0 : i32
    return %c0_i32, %c0_i32_0 : i32, i32
  }
  func.func @transform_7(%arg0: i32) -> (i32, i32) {
    %c0_i32 = arith.constant 0 : i32
    %c0_i32_0 = arith.constant 0 : i32
    %c0_i32_1 = arith.constant 0 : i32
    return %c0_i32, %c0_i32_0 : i32, i32
  }
  func.func @transform_8(%arg0: i32) -> (i32, i32) {
    %c0_i32 = arith.constant 0 : i32
    %c0_i32_0 = arith.constant 0 : i32
    %c0_i32_1 = arith.constant 0 : i32
    return %c0_i32, %c0_i32_0 : i32, i32
  }
  func.func @transform_9(%arg0: i32) -> (i32, i32) {
    %c0_i32 = arith.constant 0 : i32
    %c0_i32_0 = arith.constant 0 : i32
    %c0_i32_1 = arith.constant 0 : i32
    return %c0_i32, %c0_i32_0 : i32, i32
  }
  func.func @transform_10(%arg0: i32) -> (i32, i32) {
    %c0_i32 = arith.constant 0 : i32
    %c0_i32_0 = arith.constant 0 : i32
    %c0_i32_1 = arith.constant 0 : i32
    return %c0_i32, %c0_i32_0 : i32, i32
  }
  func.func @transform_11(%arg0: i32) -> (i32, i32) {
    %c0_i32 = arith.constant 0 : i32
    %c0_i32_0 = arith.constant 0 : i32
    %c0_i32_1 = arith.constant 0 : i32
    return %c0_i32, %c0_i32_0 : i32, i32
  }
  func.func @transform_12(%arg0: i32) -> (i32, i32) {
    %c0_i32 = arith.constant 0 : i32
    %c0_i32_0 = arith.constant 0 : i32
    return %arg0, %c0_i32 : i32, i32
  }
  func.func @transform_13(%arg0: i32) -> (i32, i32) {
    %c0_i32 = arith.constant 0 : i32
    %c0_i32_0 = arith.constant 0 : i32
    return %arg0, %c0_i32 : i32, i32
  }
  func.func @transform_14(%arg0: i32) -> (i32, i32) {
    %c0_i32 = arith.constant 0 : i32
    %c0_i32_0 = arith.constant 0 : i32
    return %arg0, %c0_i32 : i32, i32
  }
  func.func @transform_15(%arg0: i32) -> (i32, i32) {
    %c0_i32 = arith.constant 0 : i32
    %c0_i32_0 = arith.constant 0 : i32
    return %arg0, %c0_i32 : i32, i32
  }
}

</mosaic_0001>

<bundles_post_ra>
// kernel: vae_forward.1
= control target key start
LH: loop header
LB: loop body
LE: loop exit
PB: predicated region body
PF: predicated region fallthrough
CT: control target
= control target key end

     0   :  { %v2311_v60 = vmov 0.0   ;;  %vm2312_vm0 = vmmov 0   ;;  %s3183_s4 = inlined_call_operand.vmem [shape: bf16[768,128], index: 4, kind: input, shape index: {}]   ;;  %s3184_s0 = inlined_call_operand.vmem [shape: f32[8,768], index: 0, kind: input, shape index: {}]   ;;  %s3185_s6 = inlined_call_operand.vmem [shape: bf16[128,128], index: 6, kind: input, shape index: {}]   ;;  %s3186_s5 = inlined_call_operand.vmem [shape: f32[1,128], index: 5, kind: input, shape index: {}]   ;;  %s3187_s8 = inlined_call_operand.vmem [shape: bf16[128,128], index: 8, kind: input, shape index: {}]   ;;  %s3188_s10 = inlined_call_operand.vmem [shape: bf16[128,768], index: 10, kind: input, shape index: {}]   ;;  %s3189_s7 = inlined_call_operand.vmem [shape: f32[1,128], index: 7, kind: input, shape index: {}]   ;;  %s3190_s1 = inlined_call_operand.vmem [shape: f32[8,128], index: 1, kind: input, shape index: {}]   ;;  %s3191_s12 = inlined_call_operand.vmem [shape: f32[8,128], index: 12, kind: output, shape index: {0}]   ;;  %s3192_s9 = inlined_call_operand.vmem [shape: f32[1,128], index: 9, kind: input, shape index: {}]   ;;  %s3193_s11 = inlined_call_operand.vmem [shape: f32[1,768], index: 11, kind: input, shape index: {}]   ;;  %s3194_s13 = inlined_call_operand.vmem [shape: f32[8,768], index: 13, kind: output, shape index: {1}]   ;;  %s3195_s2 = inlined_call_operand.vmem [shape: f32[8,768], index: 2, kind: input, shape index: {}]   ;;  %s3196_s3 = inlined_call_operand.vmem [shape: f32[8,768], index: 3, kind: input, shape index: {}]   ;;  %s3197_s15 = inlined_call_operand.vmem [shape: f32[8,128], index: 15, kind: output, shape index: {3}]   ;;  %s3198_s14 = inlined_call_operand.vmem [shape: f32[8,128], index: 14, kind: output, shape index: {2}]  }
   0x1   :  { %v2085_v0 = vld [vmem:[%s3183_s4 + $0x78] sm:$0xff]   ;;  %v2089_v4 = vld [vmem:[%s3183_s4 + $0x70] sm:$0xff]   ;;  %v2093_v8 = vld [vmem:[%s3183_s4 + $0x68] sm:$0xff]  }
   0x2   :  { %v2086_v1 = vld [vmem:[%s3183_s4 + $0x38] sm:$0xff]   ;;  %1957 = vmatprep.subr.bf16.mxu0 %v2085_v0  ;;  %v2090_v5 = vld [vmem:[%s3183_s4 + $0x30] sm:$0xff]   ;;  %v2094_v9 = vld [vmem:[%s3183_s4 + $0x28] sm:$0xff]  }
   0x3   :  { %v2087_v2 = vld [vmem:[%s3183_s4 + $0xf8] sm:$0xff]   ;;  %1958 = vmatpush3.bf16.msra.mxu0 %v2086_v1  ;;  %v2091_v6 = vld [vmem:[%s3183_s4 + $0xf0] sm:$0xff]   ;;  %v2095_v10 = vld [vmem:[%s3183_s4 + $0xe8] sm:$0xff]  }
   0x4   :  { %v2088_v3 = vld [vmem:[%s3183_s4 + $0xb8] sm:$0xff]   ;;  %1979 = vmatprep.subr.bf16.mxu1 %v2087_v2  ;;  %1959 = vmatprep.subr.bf16.mxu0 %v2089_v4  ;;  %v2092_v7 = vld [vmem:[%s3183_s4 + $0xb0] sm:$0xff]   ;;  %v2096_v11 = vld [vmem:[%s3183_s4 + $0xa8] sm:$0xff]  }
   0x5   :  { %1980 = vmatpush3.bf16.msra.mxu1 %v2088_v3  ;;  %v2097_v12 = vld [vmem:[%s3183_s4 + $0x60] sm:$0xff]   ;;  %v2101_v16 = vld [vmem:[%s3183_s4 + $0x58] sm:$0xff]   ;;  %v2105_v20 = vld [vmem:[%s3183_s4 + $0x50] sm:$0xff]  }
   0x6   :  { %1981 = vmatprep.subr.bf16.mxu1 %v2091_v6  ;;  %v2098_v13 = vld [vmem:[%s3183_s4 + $0x20] sm:$0xff]   ;;  %v2102_v17 = vld [vmem:[%s3183_s4 + $0x18] sm:$0xff]   ;;  %v2106_v21 = vld [vmem:[%s3183_s4 + $0x10] sm:$0xff]  }
   0x7   :  { %1960 = vmatpush3.bf16.msra.mxu0 %v2090_v5  ;;  %v2099_v14 = vld [vmem:[%s3183_s4 + $0xe0] sm:$0xff]   ;;  %v2103_v18 = vld [vmem:[%s3183_s4 + $0xd8] sm:$0xff]   ;;  %v2107_v22 = vld [vmem:[%s3183_s4 + $0xd0] sm:$0xff]  }
   0x8   :  { %1961 = vmatprep.subr.bf16.mxu0 %v2093_v8  ;;  %v2100_v15 = vld [vmem:[%s3183_s4 + $0xa0] sm:$0xff]   ;;  %v2104_v19 = vld [vmem:[%s3183_s4 + $0x98] sm:$0xff]   ;;  %v2108_v23 = vld [vmem:[%s3183_s4 + $0x90] sm:$0xff]  }
   0x9   :  { %1982 = vmatpush3.bf16.msra.mxu1 %v2092_v7  ;;  %v2109_v24 = vld [vmem:[%s3183_s4 + $0x48] sm:$0xff]   ;;  %v2113_v28 = vld [vmem:[%s3183_s4 + $0x40] sm:$0xff]   ;;  %v2117_v36 = vld [vmem:[%s3183_s4 + $0x178] sm:$0xff]  }
   0xa   :  { %1983 = vmatprep.subr.bf16.mxu1 %v2095_v10  ;;  %v2110_v25 = vld [vmem:[%s3183_s4 + $0x8] sm:$0xff]   ;;  %v2114_v29 = vld [vmem:[%s3183_s4] sm:$0xff]   ;;  %v49_v37 = vld [vmem:[%s3184_s0 + $0x18] sm:$0xff] }
   0xb   :  { %1962 = vmatpush3.bf16.msra.mxu0 %v2094_v9  ;;  %v2111_v26 = vld [vmem:[%s3183_s4 + $0xc8] sm:$0xff]   ;;  %v2115_v30 = vld [vmem:[%s3183_s4 + $0xc0] sm:$0xff]   ;;  %v248_v38 = vpack.c.bf16 %v49_v37, %v49_v37  ;;  %v2118_v39 = vld [vmem:[%s3183_s4 + $0x138] sm:$0xff]  }
   0xc   :  { %1963 = vmatprep.subr.bf16.mxu0 %v2097_v12  ;;  %v2112_v27 = vld [vmem:[%s3183_s4 + $0x88] sm:$0xff]   ;;  %v2116_v33 = vld [vmem:[%s3183_s4 + $0x80] sm:$0xff]   ;;  %v48_v40 = vld [vmem:[%s3184_s0 + $0x10] sm:$0xff] }
   0xd   :  { %1984 = vmatpush3.bf16.msra.mxu1 %v2096_v11  ;;  %v47_v31 = vld [vmem:[%s3184_s0 + $0x8] sm:$0xff]  ;;  %v46_v34 = vld [vmem:[%s3184_s0] sm:$0xff]  ;;  %617 = vmatprep.mubr.bf16.mxu1 %v248_v38  ;;  %v247_v41 = vpack.c.bf16 %v48_v40, %v48_v40  ;;  %v2119_v42 = vld [vmem:[%s3183_s4 + $0x170] sm:$0xff]  }
   0xe   :  { %1985 = vmatprep.subr.bf16.mxu1 %v2099_v14  ;;  %v246_v32 = vpack.c.bf16 %v47_v31, %v47_v31  ;;  %v245_v35 = vpack.c.bf16 %v46_v34, %v46_v34  ;;  %v2120_v43 = vld [vmem:[%s3183_s4 + $0x130] sm:$0xff]   ;;  %v2121_v44 = vld [vmem:[%s3183_s4 + $0x168] sm:$0xff]   ;;  %v2123_v46 = vld [vmem:[%s3183_s4 + $0x160] sm:$0xff]  }
   0xf   :  { %1964 = vmatpush3.bf16.msra.mxu0 %v2098_v13  ;;  %v2122_v45 = vld [vmem:[%s3183_s4 + $0x128] sm:$0xff]   ;;  %v2124_v47 = vld [vmem:[%s3183_s4 + $0x120] sm:$0xff]   ;;  %v2125_v48 = vld [vmem:[%s3183_s4 + $0x158] sm:$0xff]  }
  0x10   :  { %1965 = vmatprep.subr.bf16.mxu0 %v2101_v16  ;;  %577 = vmatprep.mubr.bf16.mxu0 %v246_v32  ;;  %v2126_v49 = vld [vmem:[%s3183_s4 + $0x118] sm:$0xff]   ;;  %v2127_v50 = vld [vmem:[%s3183_s4 + $0x150] sm:$0xff]   ;;  %v51_v51 = vld [vmem:[%s3184_s0 + $0x28] sm:$0xff] }
  0x11   :  { %1986 = vmatpush3.bf16.msra.mxu1 %v2100_v15  ;;  %v250_v52 = vpack.c.bf16 %v51_v51, %v51_v51  ;;  %v2128_v53 = vld [vmem:[%s3183_s4 + $0x110] sm:$0xff]   ;;  %v2129_v54 = vld [vmem:[%s3183_s4 + $0x148] sm:$0xff]   ;;  %v2131_v56 = vld [vmem:[%s3183_s4 + $0x140] sm:$0xff]  }
  0x12   :  { %1987 = vmatprep.subr.bf16.mxu1 %v2103_v18  ;;  %v2130_v55 = vld [vmem:[%s3183_s4 + $0x108] sm:$0xff]   ;;  %v2132_v57 = vld [vmem:[%s3183_s4 + $0x100] sm:$0xff]   ;;  %v2133_v61 = vld [vmem:[%s3185_s6 + $0x38] sm:$0xff]  }
  0x13   :  { %1966 = vmatpush3.bf16.msra.mxu0 %v2102_v17  ;;  %v50_v58 = vld [vmem:[%s3184_s0 + $0x20] sm:$0xff]  ;;  %v2134_v62 = vld [vmem:[%s3185_s6 + $0x30] sm:$0xff]   ;;  %v2135_v63 = vld [vmem:[%s3185_s6 + $0x28] sm:$0xff]  }
  0x14   :  { %1967 = vmatprep.subr.bf16.mxu0 %v2105_v20  ;;  %v249_v59 = vpack.c.bf16 %v50_v58, %v50_v58  ;;  %v2136_v0 = vld [vmem:[%s3185_s6 + $0x20] sm:$0xff]   ;;  %v2137_v1 = vld [vmem:[%s3185_s6 + $0x18] sm:$0xff]   ;;  %v2138_v2 = vld [vmem:[%s3185_s6 + $0x10] sm:$0xff]  }
  0x15   :  { %1988 = vmatpush3.bf16.msra.mxu1 %v2104_v19  ;;  %v2139_v3 = vld [vmem:[%s3185_s6 + $0x8] sm:$0xff]   ;;  %v2140_v4 = vld [vmem:[%s3185_s6] sm:$0xff]   ;;  %v2145_v31 = vld [vmem:[%s3187_s8 + $0x18] sm:$0xff]  }
  0x16   :  { %1989 = vmatprep.subr.bf16.mxu1 %v2107_v22  ;;  %v1815_v14 = vld [vmem:[%s3186_s5] ss:$0 sm:$0xff]  ;;  %v2146_v32 = vld [vmem:[%s3187_s8 + $0x10] sm:$0xff]   ;;  %v2157_v38 = vld [vmem:[%s3188_s10 + $0x124] ss:$24 sps:$4 sm:$0xff]  }
  0x17   :  { %1968 = vmatpush3.bf16.msra.mxu0 %v2106_v21  ;;  %v2148_v34 = vld [vmem:[%s3187_s8] sm:$0xff]   ;;  %v2154_v37 = vld [vmem:[%s3188_s10 + $0x15c] ss:$24 sps:$4 sm:$0xff]  }
  0x18   :  { %1969 = vmatprep.subr.bf16.mxu0 %v2109_v24  ;;  %v2163_v40 = vld [vmem:[%s3188_s10 + $0xf4] ss:$24 sps:$4 sm:$0xff]  }
  0x19   :  { %1990 = vmatpush3.bf16.msra.mxu1 %v2108_v23 }
  0x1a   :  { %1991 = vmatprep.subr.bf16.mxu1 %v2111_v26 }
  0x1b   :  { %1970 = vmatpush3.bf16.msra.mxu0 %v2110_v25 }
  0x1c   :  { %1971 = vmatprep.subr.bf16.mxu0 %v2113_v28  ;;  %v2142_v28 = vld [vmem:[%s3187_s8 + $0x30] sm:$0xff]  }
  0x1d   :  { %1992 = vmatpush3.bf16.msra.mxu1 %v2112_v27  ;;  %v2141_v27 = vld [vmem:[%s3187_s8 + $0x38] sm:$0xff]  }
  0x1e   :  { %1993 = vmatprep.subr.bf16.mxu1 %v2115_v30  ;;  %v2144_v30 = vld [vmem:[%s3187_s8 + $0x20] sm:$0xff]  }
  0x1f   :  { %1972 = vmatpush3.bf16.msra.mxu0 %v2114_v29  ;;  %v2143_v29 = vld [vmem:[%s3187_s8 + $0x28] sm:$0xff]  }
  0x20   :  { %2001 = vmatprep.subr.bf16.mxu0 %v2117_v36  ;;  %v2151_v36 = vld [vmem:[%s3188_s10 + $0x154] ss:$24 sps:$4 sm:$0xff]  }
  0x21   :  { %1994 = vmatpush3.bf16.msra.mxu1 %v2116_v33  ;;  %v2147_v33 = vld [vmem:[%s3187_s8 + $0x8] sm:$0xff]  }
  0x22   :  { %578 = vmatmul.mubr.bf16.vlgmr.msra.gmra.mxu0 %v245_v35  ;;  %2041 = vmatprep.subr.bf16.mxu1 %v2311_v60  ;;  %v2149_v35 = vld [vmem:[%s3188_s10 + $0x150] ss:$24 sps:$4 sm:$0xff]  }
  0x23   :  { %2002 = vmatpush3.bf16.msra.mxu0 %v2118_v39  ;;  %657 = vmatprep.mubr.bf16.mxu0 %v250_v52  ;;  %v2155_v39 = vld [vmem:[%s3188_s10 + $0x120] ss:$24 sps:$4 sm:$0xff]  }
  0x24   :  { %618 = vmatmul.mubr.bf16.vlgmr.msra.gmra.mxu1 %v247_v41  ;;  %2003 = vmatprep.subr.bf16.mxu0 %v2119_v42  ;;  %v2161_v41 = vld [vmem:[%s3188_s10 + $0xf0] ss:$24 sps:$4 sm:$0xff]   ;;  %v2169_v42 = vld [vmem:[%s3188_s10 + $0xc4] ss:$24 sps:$4 sm:$0xff]  }
  0x25   :  { %2042 = vmatpush3.bf16.msra.mxu1 %v2133_v61  ;;  %2057 = vmatprep.mubr.msk.bf16.mxu1 %vm2312_vm0, %v2311_v60 }
  0x26   :  { %2043 = vmatprep.subr.bf16.mxu1 %v2311_v60 }
  0x27   :  { %2004 = vmatpush3.bf16.msra.mxu0 %v2120_v43  ;;  %v2167_v43 = vld [vmem:[%s3188_s10 + $0xc0] ss:$24 sps:$4 sm:$0xff]  }
  0x28   :  { %2005 = vmatprep.subr.bf16.mxu0 %v2121_v44  ;;  %v2175_v44 = vld [vmem:[%s3188_s10 + $0x94] ss:$24 sps:$4 sm:$0xff]  }
  0x29   :  { %2044 = vmatpush3.bf16.msra.mxu1 %v2134_v62 }
  0x2a   :  { %2045 = vmatprep.subr.bf16.mxu1 %v2311_v60 }
  0x2b   :  { %2006 = vmatpush3.bf16.msra.mxu0 %v2122_v45  ;;  %v2173_v45 = vld [vmem:[%s3188_s10 + $0x90] ss:$24 sps:$4 sm:$0xff]  }
  0x2c   :  { %2007 = vmatprep.subr.bf16.mxu0 %v2123_v46  ;;  %v2181_v46 = vld [vmem:[%s3188_s10 + $0x64] ss:$24 sps:$4 sm:$0xff]  }
  0x2d   :  { %2046 = vmatpush3.bf16.msra.mxu1 %v2135_v63 }
  0x2e   :  { %2047 = vmatprep.subr.bf16.mxu1 %v2311_v60 }
  0x2f   :  { %2008 = vmatpush3.bf16.msra.mxu0 %v2124_v47  ;;  %v2179_v47 = vld [vmem:[%s3188_s10 + $0x60] ss:$24 sps:$4 sm:$0xff]  }
  0x30   :  { %2009 = vmatprep.subr.bf16.mxu0 %v2125_v48  ;;  %v2187_v48 = vld [vmem:[%s3188_s10 + $0x34] ss:$24 sps:$4 sm:$0xff]  }
  0x31   :  { %2048 = vmatpush3.bf16.msra.mxu1 %v2136_v0 }
  0x32   :  { %2049 = vmatprep.subr.bf16.mxu1 %v2311_v60 }
  0x33   :  { %2010 = vmatpush3.bf16.msra.mxu0 %v2126_v49  ;;  %v2185_v49 = vld [vmem:[%s3188_s10 + $0x30] ss:$24 sps:$4 sm:$0xff]  }
  0x34   :  { %2011 = vmatprep.subr.bf16.mxu0 %v2127_v50  ;;  %v1864_v50 = vld [vmem:[%s3189_s7] ss:$0 sm:$0xff] }
  0x35   :  { %2050 = vmatpush3.bf16.msra.mxu1 %v2137_v1  ;;  %v52_v1 = vld [vmem:[%s3190_s1] sm:$0xff] }
  0x36   :  { %2051 = vmatprep.subr.bf16.mxu1 %v2311_v60 }
  0x37   :  { %2012 = vmatpush3.bf16.msra.mxu0 %v2128_v53 }
  0x38   :  { %2013 = vmatprep.subr.bf16.mxu0 %v2129_v54 }
  0x39   :  { %2052 = vmatpush3.bf16.msra.mxu1 %v2138_v2 }
  0x3a   :  { %2053 = vmatprep.subr.bf16.mxu1 %v2311_v60 }
  0x3b   :  { %2014 = vmatpush3.bf16.msra.mxu0 %v2130_v55 }
  0x3c   :  { %2015 = vmatprep.subr.bf16.mxu0 %v2131_v56 }
  0x3d   :  { %2054 = vmatpush3.bf16.msra.mxu1 %v2139_v3 }
  0x3e   :  { %2055 = vmatprep.subr.bf16.mxu1 %v2311_v60 }
  0x3f   :  { %2016 = vmatpush3.bf16.msra.mxu0 %v2132_v57 }
  0x40   :  { %2061 = vmatprep.subr.bf16.mxu0 %v2311_v60 }
  0x41   :  { %2056 = vmatpush3.bf16.msra.mxu1 %v2140_v4 }
  0x42   :  { %658 = vmatmul.mubr.bf16.vlgmr.msra.gmra.mxu0 %v249_v59  ;;  %1163 = vmatprep.subr.bf16.mxu1 %v2151_v36 }
  0x43   :  { %2077 = vmatprep.mubr.msk.bf16.mxu0 %vm2312_vm0, %v2311_v60  ;;  %2062 = vmatpush3.bf16.msra.mxu0 %v2141_v27  ;;  %v2188_v27 = vld [vmem:[%s3188_s10 + $0x38] ss:$24 sps:$4 sm:$0xff]  }
  0x44   :  { %2063 = vmatprep.subr.bf16.mxu0 %v2311_v60 }
  0x47   :  { %2064 = vmatpush3.bf16.msra.mxu0 %v2142_v28  ;;  %v2193_v28 = vld [vmem:[%s3188_s10 + $0x4] ss:$24 sps:$4 sm:$0xff]  }
  0x48   :  { %2065 = vmatprep.subr.bf16.mxu0 %v2311_v60 }
  0x4b   :  { %2066 = vmatpush3.bf16.msra.mxu0 %v2143_v29  ;;  %v2191_v29 = vld [vmem:[%s3188_s10] ss:$24 sps:$4 sm:$0xff]  }
  0x4c   :  { %2067 = vmatprep.subr.bf16.mxu0 %v2311_v60 }
  0x4f   :  { %2068 = vmatpush3.bf16.msra.mxu0 %v2144_v30  ;;  %v2196_v30 = vld [vmem:[%s3188_s10 + $0xc] ss:$24 sps:$4 sm:$0xff]  }
  0x50   :  { %2069 = vmatprep.subr.bf16.mxu0 %v2311_v60 }
  0x53   :  { %2070 = vmatpush3.bf16.msra.mxu0 %v2145_v31  ;;  %v2194_v31 = vld [vmem:[%s3188_s10 + $0x8] ss:$24 sps:$4 sm:$0xff]  }
  0x54   :  { %2071 = vmatprep.subr.bf16.mxu0 %v2311_v60 }
  0x57   :  { %2072 = vmatpush3.bf16.msra.mxu0 %v2146_v32  ;;  %v2199_v32 = vld [vmem:[%s3188_s10 + $0x164] ss:$24 sps:$4 sm:$0xff]  }
  0x58   :  { %2073 = vmatprep.subr.bf16.mxu0 %v2311_v60 }
  0x5b   :  { %2074 = vmatpush3.bf16.msra.mxu0 %v2147_v33  ;;  %v2314_v33 = vmov 0  }
  0x5c   :  { %2075 = vmatprep.subr.bf16.mxu0 %v2311_v60 }
  0x5f   :  { %2076 = vmatpush3.bf16.msra.mxu0 %v2148_v34  ;;  %v1874_v34 = vld [vmem:[%s3192_s9] ss:$0 sm:$0xff] }
  0x60   :  { %1204 = vmatprep.subr.bf16.mxu0 %v2154_v37 }
  0xe2   :  { %v1973_v5 = vpop.f32.mrf.mxu0 }
  0xe4   :  { %v1974_v6 = vpop.f32.mrf.mxu0  ;;  %v1995_v7 = vpop.f32.mrf.mxu1 }
  0xe5   :  { %v1975_v13 = vadd.f32 %v1974_v6, %v1973_v5  ;;  %v2152_v6 = vld [vmem:[%s3188_s10 + $0x158] ss:$24 sps:$4 sm:$0xff]  }
  0xe6   :  { %v1976_v8 = vpop.f32.mrf.mxu0  ;;  %v1996_v9 = vpop.f32.mrf.mxu1 }
  0xe7   :  { %v580_v15 = vadd.f32 %v1975_v13, %v1815_v14  ;;  %v1997_v16 = vadd.f32 %v1996_v9, %v1995_v7  ;;  %v2160_v7 = vld [vmem:[%s3188_s10 + $0x12c] ss:$24 sps:$4 sm:$0xff]   ;;  %v2158_v13 = vld [vmem:[%s3188_s10 + $0x128] ss:$24 sps:$4 sm:$0xff]   ;;  %v2166_v14 = vld [vmem:[%s3188_s10 + $0xfc] ss:$24 sps:$4 sm:$0xff]  }
  0xe8   :  { %v1977_v10 = vpop.f32.mrf.mxu0  ;;  %v1998_v11 = vpop.f32.mrf.mxu1 }
  0xe9   :  { %v620_v19 = vadd.f32 %v1997_v16, %v580_v15  ;;  %v2313_v10 = vmov 1.0|1.0  }
  0xea   :  { %v1999_v12 = vpop.f32.mrf.mxu1 }
 0x102   :  { %v2017_v17 = vpop.f32.mrf.mxu0 }
 0x104   :  { %v2018_v18 = vpop.f32.mrf.mxu0 }
 0x105   :  { %v2019_v20 = vadd.f32 %v2018_v18, %v2017_v17  ;;  %v2164_v18 = vld [vmem:[%s3188_s10 + $0xf8] ss:$24 sps:$4 sm:$0xff]  }
 0x106   :  { %v2020_v21 = vpop.f32.mrf.mxu0 }
 0x107   :  { %v660_v22 = vadd.f32 %v2019_v20, %v620_v19  ;;  %v2172_v19 = vld [vmem:[%s3188_s10 + $0xcc] ss:$24 sps:$4 sm:$0xff]   ;;  %v2170_v21 = vld [vmem:[%s3188_s10 + $0xc8] ss:$24 sps:$4 sm:$0xff]  }
 0x108   :  { %v2021_v23 = vpop.f32.mrf.mxu0 }
 0x109   :  { %vm665_vm1 = vcmp.gt.f32.partialorder %v660_v22, 0.0  ;;  %v666_v24 = vmul.f32 0.01, %v660_v22  ;;  %v2176_v23 = vld [vmem:[%s3188_s10 + $0x98] ss:$24 sps:$4 sm:$0xff]  }
 0x10b   :  { %v667_v25 = vsel %vm665_vm1, %v660_v22, %v666_v24  ;;  %v2178_v22 = vld [vmem:[%s3188_s10 + $0x9c] ss:$24 sps:$4 sm:$0xff]   ;;  %v2184_v24 = vld [vmem:[%s3188_s10 + $0x6c] ss:$24 sps:$4 sm:$0xff]  }
 0x10c   :  { %v668_v26 = vpack.c.bf16 %v667_v25, %v667_v25  ;;  %v2182_v25 = vld [vmem:[%s3188_s10 + $0x68] ss:$24 sps:$4 sm:$0xff]  }
 0x10e   :  { %2058 = vmatmul.mubr.bf16.vlgmr.msra.gmra.mxu1 %v668_v26  ;;  %v2190_v26 = vld [vmem:[%s3188_s10 + $0x3c] ss:$24 sps:$4 sm:$0xff]  }
 0x10f   :  { %1164 = vmatpush1.bf16.msra.mxu1 %v2149_v35  ;;  %1195 = vmatprep.mubr.bf16.mxu1 %v2314_v33 }
 0x110   :  { %1165 = vmatprep.subr.bf16.mxu1 %v2157_v38 }
 0x113   :  { %1166 = vmatpush1.bf16.msra.mxu1 %v2155_v39 }
 0x114   :  { %1167 = vmatprep.subr.bf16.mxu1 %v2163_v40 }
 0x117   :  { %1168 = vmatpush1.bf16.msra.mxu1 %v2161_v41  ;;  %v2197_v41 = vld [vmem:[%s3188_s10 + $0x160] ss:$24 sps:$4 sm:$0xff]  }
 0x118   :  { %1169 = vmatprep.subr.bf16.mxu1 %v2169_v42 }
 0x11b   :  { %1170 = vmatpush1.bf16.msra.mxu1 %v2167_v43 }
 0x11c   :  { %1171 = vmatprep.subr.bf16.mxu1 %v2175_v44  ;;  %v2202_v44 = vld [vmem:[%s3188_s10 + $0x134] ss:$24 sps:$4 sm:$0xff]  }
 0x11f   :  { %1172 = vmatpush1.bf16.msra.mxu1 %v2173_v45  ;;  %v2200_v45 = vld [vmem:[%s3188_s10 + $0x130] ss:$24 sps:$4 sm:$0xff]  }
 0x120   :  { %1173 = vmatprep.subr.bf16.mxu1 %v2181_v46  ;;  %v2205_v46 = vld [vmem:[%s3188_s10 + $0x104] ss:$24 sps:$4 sm:$0xff]  }
 0x123   :  { %1174 = vmatpush1.bf16.msra.mxu1 %v2179_v47  ;;  %v2203_v47 = vld [vmem:[%s3188_s10 + $0x100] ss:$24 sps:$4 sm:$0xff]  }
 0x124   :  { %1175 = vmatprep.subr.bf16.mxu1 %v2187_v48  ;;  %v2208_v48 = vld [vmem:[%s3188_s10 + $0xd4] ss:$24 sps:$4 sm:$0xff]  }
 0x127   :  { %1176 = vmatpush1.bf16.msra.mxu1 %v2185_v49  ;;  %v2206_v49 = vld [vmem:[%s3188_s10 + $0xd0] ss:$24 sps:$4 sm:$0xff]  }
 0x128   :  { %1177 = vmatprep.subr.bf16.mxu1 %v2193_v28 }
 0x12b   :  { %1178 = vmatpush1.bf16.msra.mxu1 %v2191_v29 }
 0x12c   :  { %1245 = vmatprep.subr.bf16.mxu1 %v2199_v32 }
 0x1ce   :  { %v757_v51 = vpop.f32.mrf.mxu1 }
 0x1cf   :  { %v758_v52 = vadd.f32 %v1864_v50, %v757_v51  ;;  %v2211_v50 = vld [vmem:[%s3188_s10 + $0xa4] ss:$24 sps:$4 sm:$0xff]   ;;  %v2209_v51 = vld [vmem:[%s3188_s10 + $0xa0] ss:$24 sps:$4 sm:$0xff]  }
 0x1d0   :  { %v2059_v53 = vpop.f32.mrf.mxu1 }
 0x1d1   :  { %v763_v54 = vand.u32 2147483647, %v758_v52  ;;  %v779_v62 = vsub.f32 0.0, %v758_v52  ;;  %vm770_vm2 = vcmp.ge.f32.partialorder %v758_v52, 0.0  ;;  %v2212_v53 = vld [vmem:[%s3188_s10 + $0x70] ss:$24 sps:$4 sm:$0xff]  }
 0x1d2   :  { %v760_v55 = vpop.f32.mrf.mxu1 }
 0x1d3   :  { %v764_v56 = vsub.f32 0.0, %v763_v54  ;;  %v780_v3 = vmax.f32 %v779_v62, 0.0  ;;  %v2217_v54 = vld [vmem:[%s3188_s10 + $0x44] ss:$24 sps:$4 sm:$0xff]   ;;  %v2215_v55 = vld [vmem:[%s3188_s10 + $0x40] ss:$24 sps:$4 sm:$0xff]  }
 0x1d4   :  { %v2060_v57 = vpop.f32.mrf.mxu1 }
 0x1d5   :  { %v765_v58 = vmul.f32 1.442695, %v764_v56  ;;  %v2220_v56 = vld [vmem:[%s3188_s10 + $0x14] ss:$24 sps:$4 sm:$0xff]   ;;  %v2218_v57 = vld [vmem:[%s3188_s10 + $0x10] ss:$24 sps:$4 sm:$0xff]  }
 0x1d7   :  { %2221 = vpow2.f32 %v765_v58  ;;  %v893_v58 = vlaneseq }
 0x1e4   :  { %v2222_v59 = vpop.eup %2221 }
 0x1e5   :  { %v767_v61 = vadd.f32 1.0, %v2222_v59 }
 0x1e7   :  { %2223 = vrcp.f32 %v767_v61 }
 0x1e8   :  { %2225 = vlog2.f32 %v767_v61 }
 0x1f4   :  { %v2224_v63 = vpop.eup %2223 }
 0x1f5   :  { %v2226_v0 = vpop.eup %2225  ;;  %v771_v2 = vmul.f32 %v2224_v63, %v2222_v59  ;;  %v894_v59 = vshrl.u32 %v893_v58, 7 }
 0x1f6   :  { %v778_v4 = vmul.f32 0.6931472, %v2226_v0 }
 0x1f7   :  { %v772_v5 = vsel %vm770_vm2, %v2224_v63, %v771_v2  ;;  %v895_v61 = vsub.s32 0, %v894_v59  ;;  %v903_v62 = vsub.s32 2, %v894_v59  ;;  %v244_v63 = vld [vmem:[%s3193_s11] sm:$0x3f]  ;;  %v899_v0 = vsub.s32 1, %v894_v59 }
 0x1f8   :  { %vm773_vm3 = vcmp.lt.f32.partialorder %v52_v1, %v772_v5  ;;  %v781_v8 = vadd.f32 %v780_v3, %v778_v4  ;;  %v785_v15 = vsub.f32 1.0, %v772_v5  ;;  %v907_v1 = vsub.s32 3, %v894_v59 }
 0x1f9   :  { %v1873_v9 = vsel %vm773_vm3, 1.0, %v2311_v60  ;;  %vm1883_vm4 = vmpackc.low %vm773_vm3, %vm773_vm3  ;;  %v896_v2 = vrot.slane %v244_v63, %v895_v61  ;;  %v904_v3 = vrot.slane %v244_v63, %v903_v62 }
 0x1fa   :  { %776 = vst [vmem:[%s3191_s12] sm:$0xff] %v1873_v9  ;;  %2078 = vmatmul.mubr.msk.bf16.vlgmr.msra.gmra.mxu0 %vm1883_vm4, %v2313_v10  ;;  %v782_v11 = vadd.f32 %v781_v8, %v758_v52  ;;  %v783_v12 = vsub.f32 0.0, %v781_v8  ;;  %v2214_v52 = vld [vmem:[%s3188_s10 + $0x74] ss:$24 sps:$4 sm:$0xff]  }
 0x1fb   :  { %1205 = vmatpush1.bf16.msra.mxu0 %v2152_v6  ;;  %1236 = vmatprep.mubr.bf16.mxu0 %v2314_v33  ;;  %v900_v6 = vrot.slane %v244_v63, %v899_v0 }
 0x1fc   :  { %1206 = vmatprep.subr.bf16.mxu0 %v2160_v7  ;;  %v784_v60 = vmul.f32 %v783_v12, %v772_v5  ;;  %v786_v16 = vsub.f32 0.0, %v782_v11  ;;  %v908_v7 = vrot.slane %v244_v63, %v907_v1 }
 0x1fe   :  { %v787_v17 = vmul.f32 %v786_v16, %v785_v15 }
 0x1ff   :  { %1207 = vmatpush1.bf16.msra.mxu0 %v2158_v13 }
 0x200   :  { %1208 = vmatprep.subr.bf16.mxu0 %v2166_v14  ;;  %v2699_v20 = vadd.f32 %v787_v17, %v784_v60 }
 0x202   :  { %3203 = vst [vmem:[#allocation2_spill] sm:$0xff] %v2699_v20 }
 0x203   :  { %1209 = vmatpush1.bf16.msra.mxu0 %v2164_v18 }
 0x204   :  { %1210 = vmatprep.subr.bf16.mxu0 %v2172_v19 }
 0x207   :  { %1211 = vmatpush1.bf16.msra.mxu0 %v2170_v21 }
 0x208   :  { %1212 = vmatprep.subr.bf16.mxu0 %v2178_v22 }
 0x20b   :  { %1213 = vmatpush1.bf16.msra.mxu0 %v2176_v23 }
 0x20c   :  { %1214 = vmatprep.subr.bf16.mxu0 %v2184_v24 }
 0x20f   :  { %1215 = vmatpush1.bf16.msra.mxu0 %v2182_v25 }
 0x210   :  { %1216 = vmatprep.subr.bf16.mxu0 %v2190_v26 }
 0x213   :  { %1217 = vmatpush1.bf16.msra.mxu0 %v2188_v27 }
 0x214   :  { %1218 = vmatprep.subr.bf16.mxu0 %v2196_v30 }
 0x217   :  { %1219 = vmatpush1.bf16.msra.mxu0 %v2194_v31 }
 0x2ba   :  { %v882_v35 = vpop.f32.mrf.mxu0 }
 0x2bb   :  { %v883_v36 = vadd.f32 %v1874_v34, %v882_v35  ;;  %v911_v35 = vsub.s32 4, %v894_v59 }
 0x2bc   :  { %v2079_v37 = vpop.f32.mrf.mxu0 }
 0x2bd   :  { %vm888_vm5 = vcmp.gt.f32.partialorder %v883_v36, 0.0  ;;  %v889_v38 = vmul.f32 0.01, %v883_v36  ;;  %v915_v37 = vsub.s32 5, %v894_v59 }
 0x2be   :  { %v885_v39 = vpop.f32.mrf.mxu0 }
 0x2bf   :  { %v890_v40 = vsel %vm888_vm5, %v883_v36, %v889_v38  ;;  %v912_v38 = vrot.slane %v244_v63, %v911_v35  ;;  %v916_v39 = vrot.slane %v244_v63, %v915_v37 }
 0x2c0   :  { %v891_v42 = vpack.c.bf16 %v890_v40, %v890_v40  ;;  %v2080_v43 = vpop.f32.mrf.mxu0 }
 0x2c2   :  { %1196 = vmatmul.mubr.bf16.vlgmr.msra.gmra.mxu1 %v891_v42  ;;  %1237 = vmatmul.mubr.bf16.vlgmr.msra.gmra.mxu0 %v891_v42 }
 0x2c3   :  { %1246 = vmatpush1.bf16.msra.mxu1 %v2197_v41  ;;  %1277 = vmatprep.mubr.bf16.mxu1 %v2314_v33 }
 0x2c4   :  { %1247 = vmatprep.subr.bf16.mxu1 %v2202_v44 }
 0x2c7   :  { %1248 = vmatpush1.bf16.msra.mxu1 %v2200_v45 }
 0x2c8   :  { %1249 = vmatprep.subr.bf16.mxu1 %v2205_v46 }
 0x2cb   :  { %1250 = vmatpush1.bf16.msra.mxu1 %v2203_v47 }
 0x2cc   :  { %1251 = vmatprep.subr.bf16.mxu1 %v2208_v48 }
 0x2cf   :  { %1252 = vmatpush1.bf16.msra.mxu1 %v2206_v49 }
 0x2d0   :  { %1253 = vmatprep.subr.bf16.mxu1 %v2211_v50 }
 0x2d3   :  { %1254 = vmatpush1.bf16.msra.mxu1 %v2209_v51 }
 0x2d4   :  { %1255 = vmatprep.subr.bf16.mxu1 %v2214_v52 }
 0x2d7   :  { %1256 = vmatpush1.bf16.msra.mxu1 %v2212_v53 }
 0x2d8   :  { %1257 = vmatprep.subr.bf16.mxu1 %v2217_v54 }
 0x2db   :  { %1258 = vmatpush1.bf16.msra.mxu1 %v2215_v55 }
 0x2dc   :  { %1259 = vmatprep.subr.bf16.mxu1 %v2220_v56 }
 0x2df   :  { %1260 = vmatpush1.bf16.msra.mxu1 %v2218_v57 }
 0x2e2   :  { %1278 = vmatmul.mubr.bf16.vlgmr.msra.gmra.mxu1 %v891_v42 }
 0x382   :  { %v1197_v4 = vpop.f32.mrf.mxu1  ;;  %v1238_v5 = vpop.f32.mrf.mxu0 }
 0x383   :  { %v2788_v8 = vadd.f32 %v1197_v4, %v896_v2  ;;  %v2790_v9 = vadd.f32 %v1238_v5, %v904_v3 }
 0x384   :  { %v1199_v10 = vpop.f32.mrf.mxu1  ;;  %v1240_v11 = vpop.f32.mrf.mxu0 }
 0x385   :  { %v1286_v12 = vand.u32 2147483647, %v2788_v8  ;;  %v1288_v13 = vand.u32 2147483647, %v2790_v9  ;;  %v2794_v14 = vadd.f32 %v1199_v10, %v900_v6  ;;  %v2796_v60 = vadd.f32 %v1240_v11, %v908_v7 }
 0x386   :  { %v1201_v15 = vpop.f32.mrf.mxu1  ;;  %v1242_v16 = vpop.f32.mrf.mxu0  ;;  %vm1328_vm6 = vcmp.ge.f32.partialorder %v2788_v8, 0.0  ;;  %vm1330_vm7 = vcmp.ge.f32.partialorder %v2790_v9, 0.0 }
 0x387   :  { %v1292_v17 = vsub.f32 0.0, %v1286_v12  ;;  %v1294_v18 = vsub.f32 0.0, %v1288_v13  ;;  %v1287_v19 = vand.u32 2147483647, %v2794_v14  ;;  %v1289_v26 = vand.u32 2147483647, %v2796_v60 }
 0x388   :  { %v1202_v21 = vpop.f32.mrf.mxu1  ;;  %v1243_v22 = vpop.f32.mrf.mxu0  ;;  %vm1329_vm8 = vcmp.ge.f32.partialorder %v2794_v14, 0.0  ;;  %v53_v14 = vld [vmem:[%s3195_s2] sm:$0xff]  ;;  %vm1331_vm9 = vcmp.ge.f32.partialorder %v2796_v60, 0.0 }
 0x389   :  { %v1298_v23 = vmul.f32 1.442695, %v1292_v17  ;;  %v1302_v24 = vmul.f32 1.442695, %v1294_v18  ;;  %v1293_v25 = vsub.f32 0.0, %v1287_v19  ;;  %v1295_v28 = vsub.f32 0.0, %v1289_v26 }
 0x38a   :  { %v59_v17 = vld [vmem:[%s3196_s3] sm:$0xff] }
 0x38b   :  { %2227 = vpow2.f32 %v1298_v23  ;;  %v1300_v27 = vmul.f32 1.442695, %v1293_v25  ;;  %v1304_v29 = vmul.f32 1.442695, %v1295_v28  ;;  %v60_v25 = vld [vmem:[%s3196_s3 + $0x8] sm:$0xff] }
 0x38c   :  { %2229 = vpow2.f32 %v1302_v24  ;;  %v54_v24 = vld [vmem:[%s3195_s2 + $0x8] sm:$0xff] }
 0x38d   :  { %2231 = vpow2.f32 %v1300_v27 }
 0x38e   :  { %2233 = vpow2.f32 %v1304_v29 }
 0x398   :  { %v2228_v30 = vpop.eup %2227 }
 0x399   :  { %v2230_v31 = vpop.eup %2229  ;;  %v1310_v32 = vadd.f32 1.0, %v2228_v30 }
 0x39a   :  { %v1312_v33 = vadd.f32 1.0, %v2230_v31  ;;  %v2232_v34 = vpop.eup %2231 }
 0x39b   :  { %2235 = vrcp.f32 %v1310_v32  ;;  %v1311_v36 = vadd.f32 1.0, %v2232_v34  ;;  %v2234_v41 = vpop.eup %2233 }
 0x39c   :  { %2237 = vrcp.f32 %v1312_v33  ;;  %v1313_v46 = vadd.f32 1.0, %v2234_v41 }
 0x39d   :  { %2239 = vrcp.f32 %v1311_v36 }
 0x39e   :  { %2241 = vrcp.f32 %v1313_v46 }
 0x3a2   :  { %v1279_v40 = vpop.f32.mrf.mxu1 }
 0x3a3   :  { %v2800_v42 = vadd.f32 %v1279_v40, %v912_v38 }
 0x3a4   :  { %v1281_v43 = vpop.f32.mrf.mxu1 }
 0x3a5   :  { %v1290_v44 = vand.u32 2147483647, %v2800_v42  ;;  %v2803_v45 = vadd.f32 %v1281_v43, %v916_v39  ;;  %vm1332_vm10 = vcmp.ge.f32.partialorder %v2800_v42, 0.0 }
 0x3a6   :  { %v1283_v47 = vpop.f32.mrf.mxu1 }
 0x3a7   :  { %v1296_v48 = vsub.f32 0.0, %v1290_v44  ;;  %v1291_v49 = vand.u32 2147483647, %v2803_v45  ;;  %vm1333_vm11 = vcmp.ge.f32.partialorder %v2803_v45, 0.0 }
 0x3a8   :  { %v2236_v50 = vpop.eup %2235  ;;  %v1284_v51 = vpop.f32.mrf.mxu1 }
 0x3a9   :  { %v2238_v52 = vpop.eup %2237  ;;  %v1334_v53 = vmul.f32 %v2236_v50, %v2228_v30  ;;  %v1297_v54 = vsub.f32 0.0, %v1291_v49  ;;  %v1306_v56 = vmul.f32 1.442695, %v1296_v48 }
 0x3aa   :  { %v1336_v55 = vmul.f32 %v2238_v52, %v2230_v31  ;;  %v2240_v57 = vpop.eup %2239 }
 0x3ab   :  { %v1340_v58 = vsel %vm1328_vm6, %v2236_v50, %v1334_v53  ;;  %v1346_v59 = vsel %vm1328_vm6, %v1334_v53, %v2236_v50  ;;  %v1308_v61 = vmul.f32 1.442695, %v1297_v54  ;;  %v1335_v0 = vmul.f32 %v2240_v57, %v2232_v34  ;;  %v2242_v6 = vpop.eup %2241 }
 0x3ac   :  { %1352 = vst [vmem:[%s3194_s13] sm:$0xff] %v1340_v58  ;;  %v1342_v62 = vsel %vm1330_vm7, %v2238_v52, %v1336_v55  ;;  %v1348_v63 = vsel %vm1330_vm7, %v1336_v55, %v2238_v52  ;;  %2243 = vpow2.f32 %v1306_v56  ;;  %v1358_v3 = vmax.f32 %v1340_v58, 1e-08  ;;  %v55_v55 = vld [vmem:[%s3195_s2 + $0x10] sm:$0xff] }
 0x3ad   :  { %1354 = vst [vmem:[%s3194_s13 + $0x10] sm:$0xff] %v1342_v62  ;;  %v1341_v1 = vsel %vm1329_vm8, %v2240_v57, %v1335_v0  ;;  %v1347_v2 = vsel %vm1329_vm8, %v1335_v0, %v2240_v57  ;;  %2245 = vpow2.f32 %v1308_v61  ;;  %v1370_v4 = vmax.f32 %v1346_v59, 1e-07  ;;  %v61_v56 = vld [vmem:[%s3196_s3 + $0x10] sm:$0xff]  ;;  %v56_v0 = vld [vmem:[%s3195_s2 + $0x18] sm:$0xff] }
 0x3ae   :  { %1353 = vst [vmem:[%s3194_s13 + $0x8] sm:$0xff] %v1341_v1  ;;  %v1364_v5 = vmul.f32 100.0, %v1358_v3  ;;  %v1360_v8 = vmax.f32 %v1342_v62, 1e-08  ;;  %v1359_v9 = vmax.f32 %v1341_v1, 1e-08  ;;  %v1337_v12 = vmul.f32 %v2242_v6, %v2234_v41 }
 0x3af   :  { %v1376_v7 = vmul.f32 100.0, %v1370_v4  ;;  %v1371_v10 = vmax.f32 %v1347_v2, 1e-07  ;;  %v1372_v18 = vmax.f32 %v1348_v63, 1e-07  ;;  %v62_v1 = vld [vmem:[%s3196_s3 + $0x18] sm:$0xff] }
 0x3b0   :  { %v1933_v11 = vadd.f32 -1.0, %v1364_v5  ;;  %v1366_v19 = vmul.f32 100.0, %v1360_v8  ;;  %v2828_v21 = vmul.f32 100.0, %v1359_v9  ;;  %v1343_v26 = vsel %vm1331_vm9, %v2242_v6, %v1337_v12 }
 0x3b1   :  { %v1939_v15 = vadd.f32 -1.0, %v1376_v7  ;;  %v2830_v22 = vmul.f32 100.0, %v1371_v10  ;;  %v1349_v27 = vsel %vm1331_vm9, %v1337_v12, %v2242_v6  ;;  %1355 = vst [vmem:[%s3194_s13 + $0x18] sm:$0xff] %v1343_v26  ;;  %v1378_v32 = vmul.f32 100.0, %v1372_v18 }
 0x3b2   :  { %v1388_v23 = vmul.f32 %v1933_v11, %v53_v14  ;;  %v1934_v30 = vadd.f32 -1.0, %v2828_v21  ;;  %v1361_v33 = vmax.f32 %v1343_v26, 1e-08  ;;  %v1373_v34 = vmax.f32 %v1349_v27, 1e-07 }
 0x3b3   :  { %v1400_v29 = vmul.f32 %v1939_v15, %v59_v17  ;;  %v1940_v31 = vadd.f32 -1.0, %v2830_v22  ;;  %v1412_v35 = vadd.f32 1.0, %v1364_v5  ;;  %v1424_v38 = vadd.f32 1.0, %v1376_v7 }
 0x3b4   :  { %v1389_v36 = vmul.f32 %v1934_v30, %v54_v24  ;;  %v1414_v39 = vadd.f32 1.0, %v1366_v19  ;;  %v1426_v43 = vadd.f32 1.0, %v1378_v32  ;;  %v1367_v44 = vmul.f32 100.0, %v1361_v33 }
 0x3b5   :  { %v1401_v37 = vmul.f32 %v1940_v31, %v60_v25  ;;  %v2846_v40 = vadd.f32 %v1400_v29, %v1388_v23  ;;  %v1379_v46 = vmul.f32 100.0, %v1373_v34  ;;  %v1418_v47 = vmul.f32 %v1412_v35, %v1364_v5 }
 0x3b6   :  { %v1436_v48 = vadd.f32 1.0, %v1412_v35  ;;  %v1935_v49 = vadd.f32 -1.0, %v1366_v19  ;;  %v1941_v50 = vadd.f32 -1.0, %v1378_v32  ;;  %v1430_v51 = vmul.f32 %v1424_v38, %v1376_v7 }
 0x3b7   :  { %3204 = vst [vmem:[#allocation3_spill] sm:$0xff] %v2846_v40  ;;  %v2848_v41 = vadd.f32 %v1401_v37, %v1389_v36  ;;  %v1448_v52 = vadd.f32 1.0, %v1424_v38  ;;  %v1420_v53 = vmul.f32 %v1414_v39, %v1366_v19  ;;  %v1438_v54 = vadd.f32 1.0, %v1414_v39 }
 0x3b8   :  { %v1432_v57 = vmul.f32 %v1426_v43, %v1378_v32  ;;  %v1450_v58 = vadd.f32 1.0, %v1426_v43  ;;  %v1936_v59 = vadd.f32 -1.0, %v1367_v44  ;;  %v1942_v61 = vadd.f32 -1.0, %v1379_v46 }
 0x3b9   :  { %v2818_v13 = vpop.eup %2243  ;;  %3205 = vst [vmem:[#allocation4_spill] sm:$0xff] %v2848_v41  ;;  %v1442_v62 = vmul.f32 %v1436_v48, %v1418_v47  ;;  %v1460_v63 = vadd.f32 1.0, %v1436_v48  ;;  %v1390_v2 = vmul.f32 %v1935_v49, %v55_v55  ;;  %v1402_v3 = vmul.f32 %v1941_v50, %v61_v56 }
 0x3ba   :  { %v2823_v16 = vpop.eup %2245  ;;  %v1314_v28 = vadd.f32 1.0, %v2818_v13  ;;  %v1454_v4 = vmul.f32 %v1448_v52, %v1430_v51  ;;  %v1472_v5 = vadd.f32 1.0, %v1448_v52  ;;  %v1444_v6 = vmul.f32 %v1438_v54, %v1420_v53 }
 0x3bb   :  { %v1315_v60 = vadd.f32 1.0, %v2823_v16  ;;  %v1413_v7 = vadd.f32 1.0, %v2828_v21  ;;  %v1456_v8 = vmul.f32 %v1450_v58, %v1432_v57  ;;  %v1425_v9 = vadd.f32 1.0, %v2830_v22 }
 0x3bc   :  { %2247 = vrcp.f32 %v1314_v28  ;;  %v1391_v10 = vmul.f32 %v1936_v59, %v56_v0  ;;  %v1403_v11 = vmul.f32 %v1942_v61, %v62_v1  ;;  %v1466_v14 = vmul.f32 %v1460_v63, %v1442_v62 }
 0x3bd   :  { %2249 = vrcp.f32 %v1315_v60  ;;  %v1462_v15 = vadd.f32 1.0, %v1438_v54  ;;  %v1474_v17 = vadd.f32 1.0, %v1450_v58  ;;  %v1415_v18 = vadd.f32 1.0, %v1367_v44 }
 0x3be   :  { %v1427_v19 = vadd.f32 1.0, %v1379_v46  ;;  %v2867_v24 = vadd.f32 %v1402_v3, %v1390_v2  ;;  %v2869_v25 = vadd.f32 %v1403_v11, %v1391_v10  ;;  %v1478_v26 = vmul.f32 %v1472_v5, %v1454_v4 }
 0x3bf   :  { %v1484_v27 = vadd.f32 1.0, %v1460_v63  ;;  %v1419_v28 = vmul.f32 %v1413_v7, %v2828_v21  ;;  %v1437_v29 = vadd.f32 1.0, %v1413_v7  ;;  %v1496_v31 = vadd.f32 1.0, %v1472_v5 }
 0x3c0   :  { %3206 = vst [vmem:[#allocation5_spill] sm:$0xff] %v2867_v24  ;;  %3207 = vst [vmem:[#allocation6_spill] sm:$0xff] %v2869_v25  ;;  %v1431_v60 = vmul.f32 %v1425_v9, %v2830_v22  ;;  %v1449_v32 = vadd.f32 1.0, %v1425_v9  ;;  %v1468_v34 = vmul.f32 %v1462_v15, %v1444_v6  ;;  %v1421_v35 = vmul.f32 %v1415_v18, %v1367_v44 }
 0x3c1   :  { %v1480_v37 = vmul.f32 %v1474_v17, %v1456_v8  ;;  %v1486_v21 = vadd.f32 1.0, %v1462_v15  ;;  %v1433_v38 = vmul.f32 %v1427_v19, %v1379_v46  ;;  %v1451_v39 = vadd.f32 1.0, %v1427_v19 }
 0x3c2   :  { %v1498_v43 = vadd.f32 1.0, %v1474_v17  ;;  %v1443_v47 = vmul.f32 %v1437_v29, %v1419_v28  ;;  %v1461_v22 = vadd.f32 1.0, %v1437_v29  ;;  %v1490_v49 = vmul.f32 %v1484_v27, %v1466_v14 }
 0x3c3   :  { %v1502_v50 = vmul.f32 %v1496_v31, %v1478_v26  ;;  %v1455_v44 = vmul.f32 %v1449_v32, %v1431_v60  ;;  %v1473_v51 = vadd.f32 1.0, %v1449_v32  ;;  %v1508_v52 = vadd.f32 1.0, %v1484_v27 }
 0x3c4   :  { %v1492_v46 = vmul.f32 %v1486_v21, %v1468_v34  ;;  %v1457_v55 = vmul.f32 %v1451_v39, %v1433_v38  ;;  %v1475_v56 = vadd.f32 1.0, %v1451_v39  ;;  %v1504_v58 = vmul.f32 %v1498_v43, %v1480_v37 }
 0x3c5   :  { %v1467_v59 = vmul.f32 %v1461_v22, %v1443_v47  ;;  %v1479_v63 = vmul.f32 %v1473_v51, %v1455_v44  ;;  %v1485_v0 = vadd.f32 1.0, %v1461_v22  ;;  %v1497_v1 = vadd.f32 1.0, %v1473_v51 }
 0x3c6   :  { %v1510_v3 = vadd.f32 1.0, %v1486_v21  ;;  %v1522_v4 = vadd.f32 1.0, %v1498_v43  ;;  %v1481_v7 = vmul.f32 %v1475_v56, %v1457_v55  ;;  %v1499_v8 = vadd.f32 1.0, %v1475_v56 }
 0x3c7   :  { %v1514_v11 = vmul.f32 %v1508_v52, %v1490_v49  ;;  %v1491_v15 = vmul.f32 %v1485_v0, %v1467_v59  ;;  %v1503_v17 = vmul.f32 %v1497_v1, %v1479_v63  ;;  %v1521_v19 = vadd.f32 1.0, %v1497_v1 }
 0x3c8   :  { %v1532_v45 = vadd.f32 1.0, %v1508_v52  ;;  %v1505_v28 = vmul.f32 %v1499_v8, %v1481_v7  ;;  %v1523_v29 = vadd.f32 1.0, %v1499_v8  ;;  %v1516_v60 = vmul.f32 %v1510_v3, %v1492_v46 }
 0x3c9   :  { %v2248_v12 = vpop.eup %2247  ;;  %v1528_v32 = vmul.f32 %v1522_v4, %v1504_v58  ;;  %v1545_v37 = vadd.f32 1.0, %v1521_v19  ;;  %v1534_v21 = vadd.f32 1.0, %v1510_v3  ;;  %v1546_v38 = vadd.f32 1.0, %v1522_v4 }
 0x3ca   :  { %v1338_v23 = vmul.f32 %v2248_v12, %v2818_v13  ;;  %v2250_v30 = vpop.eup %2249  ;;  %v1439_v13 = vadd.f32 1.0, %v1415_v18  ;;  %v1509_v18 = vadd.f32 1.0, %v1485_v0  ;;  %v1529_v47 = vmul.f32 %v1523_v29, %v1505_v28 }
 0x3cb   :  { %v1339_v36 = vmul.f32 %v2250_v30, %v2823_v16  ;;  %v1520_v16 = vadd.f32 1.0, %v1496_v31  ;;  %v1547_v49 = vadd.f32 1.0, %v1523_v29  ;;  %v1556_v52 = vadd.f32 1.0, %v1532_v45 }
 0x3cc   :  { %v1344_v33 = vsel %vm1332_vm10, %v2248_v12, %v1338_v23  ;;  %v1445_v53 = vmul.f32 %v1439_v13, %v1421_v35  ;;  %v1463_v54 = vadd.f32 1.0, %v1439_v13  ;;  %v1350_v61 = vsel %vm1332_vm10, %v1338_v23, %v2248_v12 }
 0x3cd   :  { %1356 = vst [vmem:[%s3194_s13 + $0x20] sm:$0xff] %v1344_v33  ;;  %v1345_v48 = vsel %vm1333_vm11, %v2250_v30, %v1339_v36  ;;  %v1362_v57 = vmax.f32 %v1344_v33, 1e-08  ;;  %v1351_v2 = vsel %vm1333_vm11, %v1339_v36, %v2250_v30  ;;  %v1374_v10 = vmax.f32 %v1350_v61, 1e-07 }
 0x3ce   :  { %1357 = vst [vmem:[%s3194_s13 + $0x28] sm:$0xff] %v1345_v48  ;;  %v1363_v62 = vmax.f32 %v1345_v48, 1e-08  ;;  %v1469_v5 = vmul.f32 %v1463_v54, %v1445_v53  ;;  %v1487_v6 = vadd.f32 1.0, %v1463_v54  ;;  %v1526_v14 = vmul.f32 %v1520_v16, %v1502_v50 }
 0x3cf   :  { %v2888_v9 = vmul.f32 100.0, %v1362_v57  ;;  %v1375_v12 = vmax.f32 %v1351_v2, 1e-07  ;;  %v1544_v23 = vadd.f32 1.0, %v1520_v16  ;;  %v2892_v30 = vmul.f32 100.0, %v1374_v10 }
 0x3d0   :  { %v2890_v42 = vmul.f32 100.0, %v1363_v62  ;;  %v1493_v26 = vmul.f32 %v1487_v6, %v1469_v5  ;;  %v1511_v27 = vadd.f32 1.0, %v1487_v6  ;;  %v1515_v35 = vmul.f32 %v1509_v18, %v1491_v15 }
 0x3d1   :  { %3208 = vst [vmem:[#allocation7_spill] sm:$0xff] %v2888_v9  ;;  %3210 = vst [vmem:[#allocation9_spill] sm:$0xff] %v2892_v30  ;;  %v2895_v31 = vadd.f32 1.0, %v2888_v9  ;;  %v2897_v33 = vmul.f32 100.0, %v1375_v12  ;;  %v1527_v13 = vmul.f32 %v1521_v19, %v1503_v17  ;;  %v1533_v36 = vadd.f32 1.0, %v1509_v18 }
 0x3d2   :  { %3209 = vst [vmem:[#allocation8_spill] sm:$0xff] %v2890_v42  ;;  %v2900_v34 = vadd.f32 1.0, %v2890_v42  ;;  %v1517_v39 = vmul.f32 %v1511_v27, %v1493_v26  ;;  %v1535_v43 = vadd.f32 1.0, %v1511_v27  ;;  %v2903_v22 = vadd.f32 1.0, %v2892_v30 }
 0x3d3   :  { %3211 = vst [vmem:[#allocation10_spill] sm:$0xff] %v2897_v33  ;;  %v2906_v48 = vadd.f32 1.0, %v2895_v31  ;;  %v1538_v50 = vmul.f32 %v1532_v45, %v1514_v11  ;;  %v2909_v44 = vadd.f32 1.0, %v2897_v33  ;;  %v1550_v16 = vmul.f32 %v1544_v23, %v1526_v14 }
 0x3d4   :  { %v2912_v51 = vadd.f32 1.0, %v2900_v34  ;;  %v1539_v53 = vmul.f32 %v1533_v36, %v1515_v35  ;;  %v1551_v54 = vmul.f32 %v1545_v37, %v1527_v13  ;;  %v1557_v46 = vadd.f32 1.0, %v1533_v36 }
 0x3d5   :  { %v1540_v55 = vmul.f32 %v1534_v21, %v1516_v60  ;;  %v1541_v56 = vmul.f32 %v1535_v43, %v1517_v39  ;;  %v1552_v57 = vmul.f32 %v1546_v38, %v1528_v32  ;;  %v1558_v58 = vadd.f32 1.0, %v1534_v21 }
 0x3d6   :  { %v1452_v59 = vadd.f32 1.0, %v2903_v22  ;;  %v2916_v61 = vadd.f32 1.0, %v2906_v48  ;;  %v1553_v62 = vmul.f32 %v1547_v49, %v1529_v47  ;;  %v1559_v63 = vadd.f32 1.0, %v1535_v43 }
 0x3d7   :  { %v1453_v0 = vadd.f32 1.0, %v2909_v44  ;;  %v2920_v1 = vadd.f32 1.0, %v2912_v51  ;;  %v1568_v2 = vadd.f32 1.0, %v1544_v23  ;;  %v2922_v3 = vadd.f32 1.0, %v1556_v52 }
 0x3d8   :  { %v1569_v4 = vadd.f32 1.0, %v1545_v37  ;;  %v1570_v5 = vadd.f32 1.0, %v1546_v38  ;;  %v1571_v6 = vadd.f32 1.0, %v1547_v49  ;;  %v2924_v7 = vadd.f32 1.0, %v1557_v46 }
 0x3d9   :  { %v1562_v8 = vmul.f32 %v1556_v52, %v1538_v50  ;;  %v1563_v10 = vmul.f32 %v1557_v46, %v1539_v53  ;;  %v1564_v11 = vmul.f32 %v1558_v58, %v1540_v55  ;;  %v2926_v14 = vadd.f32 1.0, %v1558_v58 }
 0x3da   :  { %v1476_v12 = vadd.f32 1.0, %v1452_v59  ;;  %v2929_v15 = vadd.f32 1.0, %v2916_v61  ;;  %v1565_v17 = vmul.f32 %v1559_v63, %v1541_v56  ;;  %v2931_v18 = vadd.f32 1.0, %v1559_v63 }
 0x3db   :  { %v2933_v19 = vadd.f32 1.0, %v1453_v0  ;;  %v2936_v45 = vadd.f32 1.0, %v2920_v1  ;;  %v1574_v23 = vmul.f32 %v1568_v2, %v1550_v16  ;;  %2251 = vrcp.f32 %v2922_v3 }
 0x3dc   :  { %v1575_v26 = vmul.f32 %v1569_v4, %v1551_v54  ;;  %v1576_v27 = vmul.f32 %v1570_v5, %v1552_v57  ;;  %v1577_v28 = vmul.f32 %v1571_v6, %v1553_v62  ;;  %2253 = vrcp.f32 %v2924_v7 }
 0x3dd   :  { %v2940_v29 = vadd.f32 1.0, %v1568_v2  ;;  %2255 = vrcp.f32 %v2926_v14  ;;  %v2943_v60 = vadd.f32 1.0, %v1476_v12  ;;  %v2946_v32 = vadd.f32 1.0, %v2929_v15 }
 0x3de   :  { %v2948_v35 = vadd.f32 1.0, %v1569_v4  ;;  %2257 = vrcp.f32 %v2931_v18  ;;  %v2952_v13 = vadd.f32 1.0, %v2933_v19  ;;  %v2955_v36 = vadd.f32 1.0, %v2936_v45 }
 0x3df   :  { %v2957_v37 = vadd.f32 1.0, %v1570_v5  ;;  %v2959_v21 = vmul.f32 %v1574_v23, %v1562_v8  ;;  %v2961_v38 = vadd.f32 1.0, %v1571_v6  ;;  %v2963_v39 = vmul.f32 %v1575_v26, %v1563_v10 }
 0x3e0   :  { %v2965_v43 = vmul.f32 %v1576_v27, %v1564_v11  ;;  %v2967_v47 = vmul.f32 %v1577_v28, %v1565_v17  ;;  %2259 = vrcp.f32 %v2940_v29  ;;  %v1422_v49 = vmul.f32 %v2895_v31, %v2888_v9 }
 0x3e1   :  { %3212 = vst [vmem:[#allocation11_spill] sm:$0xff] %v2963_v39  ;;  %2261 = vrcp.f32 %v2948_v35  ;;  %v2974_v50 = vadd.f32 1.0, %v2943_v60  ;;  %v2977_v52 = vadd.f32 1.0, %v2946_v32  ;;  %v2981_v16 = vadd.f32 1.0, %v2952_v13 }
 0x3e2   :  { %3213 = vst [vmem:[#allocation12_spill] sm:$0xff] %v2965_v43  ;;  %3214 = vst [vmem:[#allocation13_spill] sm:$0xff] %v2967_v47  ;;  %2263 = vrcp.f32 %v2957_v37  ;;  %v2984_v53 = vadd.f32 1.0, %v2955_v36  ;;  %v1434_v31 = vmul.f32 %v2903_v22, %v2892_v30  ;;  %v1446_v54 = vmul.f32 %v2906_v48, %v1422_v49 }
 0x3e3   :  { %2265 = vrcp.f32 %v2961_v38  ;;  %v1423_v46 = vmul.f32 %v2900_v34, %v2890_v42  ;;  %v1435_v55 = vmul.f32 %v2909_v44, %v2897_v33  ;;  %v2995_v56 = vadd.f32 1.0, %v2974_v50 }
 0x3e4   :  { %v2998_v57 = vadd.f32 1.0, %v2977_v52  ;;  %v3003_v62 = vadd.f32 1.0, %v2981_v16  ;;  %v3006_v22 = vadd.f32 1.0, %v2984_v53  ;;  %v1458_v34 = vmul.f32 %v1452_v59, %v1434_v31 }
 0x3e5   :  { %v1470_v2 = vmul.f32 %v2916_v61, %v1446_v54  ;;  %v1447_v4 = vmul.f32 %v2912_v51, %v1423_v46  ;;  %v1459_v5 = vmul.f32 %v1453_v0, %v1435_v55  ;;  %v3021_v10 = vadd.f32 1.0, %v2995_v56 }
 0x3e6   :  { %v3024_v59 = vadd.f32 1.0, %v2998_v57  ;;  %v3029_v61 = vadd.f32 1.0, %v3003_v62  ;;  %v3032_v51 = vadd.f32 1.0, %v3006_v22  ;;  %v1482_v26 = vmul.f32 %v1476_v12, %v1458_v34 }
 0x3e7   :  { %2267 = vlog2.f32 %v2922_v3  ;;  %v1494_v31 = vmul.f32 %v2929_v15, %v1470_v2  ;;  %v1471_v20 = vmul.f32 %v2920_v1, %v1447_v4  ;;  %v3045_v25 = vadd.f32 1.0, %v3021_v10 }
 0x3e8   :  { %v3000_v58 = vpop.eup %2251  ;;  %2269 = vlog2.f32 %v2924_v7  ;;  %v3050_v24 = vadd.f32 1.0, %v3029_v61 }
 0x3e9   :  { %v3008_v48 = vpop.eup %2253  ;;  %v1604_v44 = vmul.f32 %v3000_v58, %v3000_v58  ;;  %2271 = vrcp.f32 %v3024_v59  ;;  %v1495_v40 = vmul.f32 %v2936_v45, %v1471_v20  ;;  %v1518_v42 = vmul.f32 %v2946_v32, %v1494_v31 }
 0x3ea   :  { %v3012_v63 = vpop.eup %2255  ;;  %v1605_v6 = vmul.f32 %v3008_v48, %v3008_v48  ;;  %2273 = vrcp.f32 %v3032_v51 }
 0x3eb   :  { %v3018_v8 = vpop.eup %2257  ;;  %v1606_v11 = vmul.f32 %v3012_v63, %v3012_v63  ;;  %v1616_v17 = vmul.f32 0.0007936508, %v1604_v44  ;;  %2275 = vlog2.f32 %v2940_v29  ;;  %v1519_v45 = vmul.f32 %v2955_v36, %v1495_v40 }
 0x3ec   :  { %v1607_v0 = vmul.f32 %v3018_v8, %v3018_v8  ;;  %v1617_v23 = vmul.f32 0.0007936508, %v1605_v6  ;;  %2277 = vlog2.f32 %v2948_v35 }
 0x3ed   :  { %v1618_v27 = vmul.f32 0.0007936508, %v1606_v11  ;;  %v1622_v28 = vsub.f32 0.0027777778, %v1616_v17  ;;  %v3037_v49 = vpop.eup %2259  ;;  %v1483_v17 = vmul.f32 %v2933_v19, %v1459_v5  ;;  %2279 = vrcp.f32 %v3045_v25 }
 0x3ee   :  { %v1619_v54 = vmul.f32 0.0007936508, %v1607_v0  ;;  %v1623_v46 = vsub.f32 0.0027777778, %v1617_v23  ;;  %v3041_v55 = vpop.eup %2261  ;;  %v1610_v23 = vmul.f32 %v3037_v49, %v3037_v49  ;;  %2281 = vrcp.f32 %v3050_v24 }
 0x3ef   :  { %v1624_v12 = vsub.f32 0.0027777778, %v1618_v27  ;;  %v2264_v34 = vpop.eup %2263  ;;  %v1611_v1 = vmul.f32 %v3041_v55, %v3041_v55  ;;  %v1628_v4 = vmul.f32 %v1622_v28, %v1604_v44  ;;  %v1507_v44 = vmul.f32 %v2952_v13, %v1483_v17 }
 0x3f0   :  { %v1625_v15 = vsub.f32 0.0027777778, %v1619_v54  ;;  %v2266_v2 = vpop.eup %2265  ;;  %v1612_v27 = vmul.f32 %v2264_v34, %v2264_v34  ;;  %v1629_v41 = vmul.f32 %v1623_v46, %v1605_v6  ;;  %v1506_v54 = vmul.f32 %v2943_v60, %v1482_v26 }
 0x3f1   :  { %v1613_v33 = vmul.f32 %v2266_v2, %v2266_v2  ;;  %v1630_v19 = vmul.f32 %v1624_v12, %v1606_v11  ;;  %v1634_v28 = vsub.f32 0.083333336, %v1628_v4  ;;  %v1646_v47 = vmul.f32 0.0007936508, %v1610_v23 }
 0x3f2   :  { %v1631_v5 = vmul.f32 %v1625_v15, %v1607_v0  ;;  %v1647_v43 = vmul.f32 0.0007936508, %v1611_v1  ;;  %v1635_v6 = vsub.f32 0.083333336, %v1629_v41  ;;  %v1648_v46 = vmul.f32 0.0007936508, %v1612_v27 }
 0x3f3   :  { %v1649_v30 = vmul.f32 0.0007936508, %v1613_v33  ;;  %v1636_v9 = vsub.f32 0.083333336, %v1630_v19  ;;  %v1652_v11 = vsub.f32 0.0027777778, %v1646_v47  ;;  %v1530_v0 = vmul.f32 %v2974_v50, %v1506_v54 }
 0x3f4   :  { %v1637_v39 = vsub.f32 0.083333336, %v1631_v5  ;;  %v1653_v60 = vsub.f32 0.0027777778, %v1647_v43  ;;  %v1654_v26 = vsub.f32 0.0027777778, %v1648_v46  ;;  %v1531_v32 = vmul.f32 %v2981_v16, %v1507_v44  ;;  %v2268_v12 = vpop.eup %2267 }
 0x3f5   :  { %v1655_v20 = vsub.f32 0.0027777778, %v1649_v30  ;;  %v1542_v13 = vmul.f32 %v2977_v52, %v1518_v42  ;;  %v1658_v31 = vmul.f32 %v1652_v11, %v1610_v23  ;;  %2283 = vlog2.f32 %v2926_v14  ;;  %v2270_v4 = vpop.eup %2269 }
 0x3f6   :  { %v1659_v17 = vmul.f32 %v1653_v60, %v1611_v1  ;;  %v1660_v41 = vmul.f32 %v1654_v26, %v1612_v27  ;;  %v1640_v47 = vmul.f32 %v3000_v58, %v1634_v28  ;;  %v1641_v43 = vmul.f32 %v3008_v48, %v1635_v6  ;;  %v3073_v40 = vpop.eup %2271 }
 0x3f7   :  { %v1661_v15 = vmul.f32 %v1655_v20, %v1613_v33  ;;  %v1642_v30 = vmul.f32 %v3012_v63, %v1636_v9  ;;  %v1664_v50 = vsub.f32 0.083333336, %v1658_v31  ;;  %v1643_v36 = vmul.f32 %v3018_v8, %v1637_v39  ;;  %v3076_v23 = vpop.eup %2273 }
 0x3f8   :  { %v1665_v42 = vsub.f32 0.083333336, %v1659_v17  ;;  %v1666_v52 = vsub.f32 0.083333336, %v1660_v41  ;;  %v1543_v33 = vmul.f32 %v2984_v53, %v1519_v45  ;;  %v1689_v27 = vmul.f32 0.6931472, %v2268_v12  ;;  %v2276_v58 = vpop.eup %2275 }
 0x3f9   :  { %v1667_v16 = vsub.f32 0.083333336, %v1661_v15  ;;  %v1670_v1 = vmul.f32 %v3037_v49, %v1664_v50  ;;  %2285 = vlog2.f32 %v2931_v18  ;;  %v1691_v19 = vmul.f32 0.6931472, %v2270_v4  ;;  %v2278_v5 = vpop.eup %2277 }
 0x3fa   :  { %v1671_v9 = vmul.f32 %v3041_v55, %v1665_v42  ;;  %v1672_v48 = vmul.f32 %v2264_v34, %v1666_v52  ;;  %v1945_v8 = vadd.f32 -0.5, %v2922_v3  ;;  %v1946_v54 = vadd.f32 -0.5, %v2924_v7  ;;  %v3087_v53 = vpop.eup %2279  ;;  %v3215_v52 = vld [vmem:[#allocation11_spill] sm:$0xff] }
 0x3fb   :  { %v1673_v63 = vmul.f32 %v2266_v2, %v1667_v16  ;;  %v3082_v39 = vadd.f32 %v1670_v1, %v1640_v47  ;;  %2287 = vlog2.f32 %v3024_v59  ;;  %v3096_v55 = vpop.eup %2281  ;;  %v1608_v34 = vmul.f32 %v3073_v40, %v3073_v40 }
 0x3fc   :  { %v3089_v49 = vadd.f32 %v1671_v9, %v1641_v43  ;;  %v3091_v44 = vadd.f32 %v1672_v48, %v1642_v30  ;;  %2289 = vlog2.f32 %v3032_v51  ;;  %v1609_v2 = vmul.f32 %v3076_v23, %v3076_v23 }
 0x3fd   :  { %v3093_v28 = vadd.f32 %v1673_v63, %v1643_v36  ;;  %v1951_v6 = vadd.f32 -0.5, %v2940_v29  ;;  %v1952_v46 = vadd.f32 -0.5, %v2948_v35  ;;  %v1700_v11 = vmul.f32 %v1945_v8, %v1689_v27 }
 0x3fe   :  { %v1701_v60 = vmul.f32 %v1946_v54, %v1691_v19  ;;  %v1713_v26 = vmul.f32 0.6931472, %v2276_v58  ;;  %v1715_v20 = vmul.f32 0.6931472, %v2278_v5  ;;  %v1554_v45 = vmul.f32 %v2995_v56, %v1530_v0 }
 0x3ff   :  { %v1555_v31 = vmul.f32 %v3003_v62, %v1531_v32  ;;  %v1614_v12 = vmul.f32 %v3087_v53, %v3087_v53  ;;  %2291 = vlog2.f32 %v2957_v37  ;;  %v1615_v17 = vmul.f32 %v3096_v55, %v3096_v55 }
 0x400   :  { %2293 = vlog2.f32 %v2961_v38  ;;  %v1724_v41 = vmul.f32 %v1951_v6, %v1713_v26  ;;  %v1725_v15 = vmul.f32 %v1952_v46, %v1715_v20  ;;  %v1566_v4 = vmul.f32 %v2998_v57, %v1542_v13 }
 0x401   :  { %v1620_v47 = vmul.f32 0.0007936508, %v1608_v34  ;;  %v1621_v43 = vmul.f32 0.0007936508, %v1609_v2  ;;  %2295 = vlog2.f32 %v3045_v25  ;;  %v1567_v56 = vmul.f32 %v3006_v22, %v1543_v33  ;;  %v3216_v22 = vld [vmem:[#allocation7_spill] sm:$0xff]  ;;  %v3217_v33 = vld [vmem:[#allocation9_spill] sm:$0xff] }
 0x402   :  { %2297 = vlog2.f32 %v3050_v24  ;;  %v1730_v62 = vadd.f32 %v1724_v41, %v1700_v11  ;;  %v1731_v0 = vadd.f32 %v1725_v15, %v1701_v60  ;;  %v2284_v32 = vpop.eup %2283  ;;  %v1578_v30 = vmul.f32 %v3021_v10, %v1554_v45  ;;  %v3218_v45 = vld [vmem:[#allocation12_spill] sm:$0xff]  ;;  %v3219_v41 = vld [vmem:[#allocation13_spill] sm:$0xff] }
 0x403   :  { %v1579_v50 = vmul.f32 %v3029_v61, %v1555_v31  ;;  %v1650_v36 = vmul.f32 0.0007936508, %v1614_v12  ;;  %2299 = vlog2.f32 %v2959_v21  ;;  %v1651_v42 = vmul.f32 0.0007936508, %v1615_v17 }
 0x404   :  { %v1736_v57 = vsub.f32 %v1730_v62, %v2922_v3  ;;  %v1737_v13 = vsub.f32 %v1731_v0, %v2924_v7  ;;  %2301 = vlog2.f32 %v3215_v52  ;;  %v3123_v16 = vadd.f32 -1.0, %v3216_v22 }
 0x405   :  { %v3126_v1 = vadd.f32 -1.0, %v3217_v33  ;;  %v1626_v27 = vsub.f32 0.0027777778, %v1620_v47  ;;  %v1627_v10 = vsub.f32 0.0027777778, %v1621_v43  ;;  %v1947_v61 = vadd.f32 -0.5, %v2926_v14 }
 0x406   :  { %v2286_v58 = vpop.eup %2285  ;;  %v1948_v21 = vadd.f32 -0.5, %v2931_v18  ;;  %v1742_v9 = vsub.f32 %v1736_v57, %v2940_v29  ;;  %v1743_v3 = vsub.f32 %v1737_v13, %v2948_v35  ;;  %v1656_v7 = vsub.f32 0.0027777778, %v1650_v36 }
 0x407   :  { %v1949_v48 = vadd.f32 -0.5, %v3024_v59  ;;  %v1950_v63 = vadd.f32 -0.5, %v3032_v51  ;;  %v1764_v19 = vmul.f32 %v1578_v30, %v1566_v4  ;;  %v1657_v8 = vsub.f32 0.0027777778, %v1651_v42 }
 0x408   :  { %v2288_v5 = vpop.eup %2287  ;;  %v1748_v54 = vadd.f32 1.837877, %v1742_v9  ;;  %v1749_v6 = vadd.f32 1.837877, %v1743_v3  ;;  %v1765_v46 = vmul.f32 %v1579_v50, %v1567_v56  ;;  %v1632_v60 = vmul.f32 %v1626_v27, %v1608_v34 }
 0x409   :  { %v2290_v11 = vpop.eup %2289  ;;  %v1633_v26 = vmul.f32 %v1627_v10, %v1609_v2  ;;  %v1693_v20 = vmul.f32 0.6931472, %v2284_v32  ;;  %2303 = vlog2.f32 %v3218_v45  ;;  %v1695_v29 = vmul.f32 0.6931472, %v2286_v58 }
 0x40a   :  { %v1754_v35 = vadd.f32 %v1748_v54, %v3082_v39  ;;  %v1755_v31 = vadd.f32 %v1749_v6, %v3089_v49  ;;  %2305 = vlog2.f32 %v3219_v41  ;;  %v1662_v15 = vmul.f32 %v1656_v7, %v1614_v12 }
 0x40b   :  { %v1697_v4 = vmul.f32 0.6931472, %v2288_v5  ;;  %v1953_v47 = vadd.f32 -0.5, %v2957_v37  ;;  %2307 = vlog2.f32 %v1764_v19  ;;  %v1663_v56 = vmul.f32 %v1657_v8, %v1615_v17 }
 0x40c   :  { %v2292_v43 = vpop.eup %2291  ;;  %v1699_v62 = vmul.f32 0.6931472, %v2290_v11  ;;  %v1954_v34 = vadd.f32 -0.5, %v2961_v38  ;;  %2309 = vlog2.f32 %v1765_v46  ;;  %v1638_v0 = vsub.f32 0.083333336, %v1632_v60 }
 0x40d   :  { %v2294_v2 = vpop.eup %2293  ;;  %v1702_v32 = vmul.f32 %v1947_v61, %v1693_v20  ;;  %v1955_v39 = vadd.f32 -0.5, %v3045_v25  ;;  %v1717_v30 = vmul.f32 0.6931472, %v2292_v43  ;;  %v1639_v50 = vsub.f32 0.083333336, %v1633_v26 }
 0x40e   :  { %v2296_v49 = vpop.eup %2295  ;;  %v1703_v36 = vmul.f32 %v1948_v21, %v1695_v29  ;;  %v1956_v12 = vadd.f32 -0.5, %v3050_v24  ;;  %v1719_v42 = vmul.f32 0.6931472, %v2294_v2  ;;  %v1668_v13 = vsub.f32 0.083333336, %v1662_v15 }
 0x40f   :  { %v2298_v57 = vpop.eup %2297  ;;  %v1704_v52 = vmul.f32 %v1949_v48, %v1697_v4  ;;  %v1721_v17 = vmul.f32 0.6931472, %v2296_v49  ;;  %v1726_v22 = vmul.f32 %v1953_v47, %v1717_v30  ;;  %v1669_v27 = vsub.f32 0.083333336, %v1663_v56  ;;  %v57_v48 = vld [vmem:[%s3195_s2 + $0x20] sm:$0xff]  ;;  %v3221_v4 = vld [vmem:[#allocation3_spill] sm:$0xff] }
 0x410   :  { %v2300_v33 = vpop.eup %2299  ;;  %v1705_v10 = vmul.f32 %v1950_v63, %v1699_v62  ;;  %v1723_v58 = vmul.f32 0.6931472, %v2298_v57  ;;  %v1727_v9 = vmul.f32 %v1954_v34, %v1719_v42  ;;  %v1644_v3 = vmul.f32 %v3073_v40, %v1638_v0 }
 0x411   :  { %v2302_v61 = vpop.eup %2301  ;;  %v1728_v7 = vmul.f32 %v1955_v39, %v1721_v17  ;;  %v1732_v19 = vadd.f32 %v1726_v22, %v1702_v32  ;;  %v1767_v5 = vmul.f32 0.6931472, %v2300_v33  ;;  %v1645_v21 = vmul.f32 %v3076_v23, %v1639_v50  ;;  %v3220_v23 = vld [vmem:[#allocation8_spill] sm:$0xff] }
 0x412   :  { %v1729_v8 = vmul.f32 %v1956_v12, %v1723_v58  ;;  %v1733_v54 = vadd.f32 %v1727_v9, %v1703_v36  ;;  %v1769_v6 = vmul.f32 0.6931472, %v2302_v61  ;;  %v1674_v46 = vmul.f32 %v3087_v53, %v1668_v13 }
 0x413   :  { %v1734_v63 = vadd.f32 %v1728_v7, %v1704_v52  ;;  %v1738_v11 = vsub.f32 %v1732_v19, %v2926_v14  ;;  %v1778_v60 = vsub.f32 %v1754_v35, %v1767_v5  ;;  %v1675_v40 = vmul.f32 %v3096_v55, %v1669_v27  ;;  %v63_v14 = vld [vmem:[%s3196_s3 + $0x20] sm:$0xff]  ;;  %v3222_v35 = vld [vmem:[#allocation4_spill] sm:$0xff] }
 0x414   :  { %v1735_v26 = vadd.f32 %v1729_v8, %v1705_v10  ;;  %v1739_v20 = vsub.f32 %v1733_v54, %v2931_v18  ;;  %v1779_v45 = vsub.f32 %v1755_v31, %v1769_v6  ;;  %v1938_v29 = vadd.f32 -1.0, %v3220_v23  ;;  %v3225_v19 = vld [vmem:[#allocation6_spill] sm:$0xff] }
 0x415   :  { %v1740_v41 = vsub.f32 %v1734_v63, %v3024_v59  ;;  %v1744_v15 = vsub.f32 %v1738_v11, %v2957_v37  ;;  %v1784_v47 = vsub.f32 %v3221_v4, %v1778_v60  ;;  %v1392_v53 = vmul.f32 %v3123_v16, %v57_v48  ;;  %v58_v37 = vld [vmem:[%s3195_s2 + $0x28] sm:$0xff]  ;;  %v3223_v59 = vld [vmem:[#allocation10_spill] sm:$0xff] }
 0x416   :  { %v2304_v43 = vpop.eup %2303  ;;  %v1741_v55 = vsub.f32 %v1735_v26, %v3032_v51  ;;  %v1745_v18 = vsub.f32 %v1739_v20, %v2961_v38  ;;  %v1785_v31 = vsub.f32 %v3222_v35, %v1779_v45  ;;  %v1944_v62 = vadd.f32 -1.0, %v3223_v59  ;;  %v64_v51 = vld [vmem:[%s3196_s3 + $0x28] sm:$0xff] }
 0x417   :  { %v2306_v56 = vpop.eup %2305  ;;  %v1680_v34 = vadd.f32 %v1674_v46, %v1644_v3  ;;  %v1746_v2 = vsub.f32 %v1740_v41, %v3045_v25  ;;  %v1750_v0 = vadd.f32 1.837877, %v1744_v15  ;;  %v1681_v16 = vadd.f32 %v1675_v40, %v1645_v21  ;;  %v3224_v3 = vld [vmem:[#allocation5_spill] sm:$0xff]  ;;  %v3226_v46 = vld [vmem:[#allocation2_spill] sm:$0xff] }
 0x418   :  { %v2308_v32 = vpop.eup %2307  ;;  %v1747_v38 = vsub.f32 %v1741_v55, %v3050_v24  ;;  %v1751_v39 = vadd.f32 1.837877, %v1745_v18  ;;  %v1790_v30 = vadd.f32 %v1785_v31, %v1784_v47  ;;  %v1404_v50 = vmul.f32 %v3126_v1, %v63_v14 }
 0x419   :  { %v2310_v49 = vpop.eup %2309  ;;  %v1752_v36 = vadd.f32 1.837877, %v1746_v2  ;;  %v1756_v12 = vadd.f32 %v1750_v0, %v3091_v44  ;;  %v1771_v42 = vmul.f32 0.6931472, %v2304_v43  ;;  %v1393_v57 = vmul.f32 %v1938_v29, %v58_v37 }
 0x41a   :  { %v1753_v25 = vadd.f32 1.837877, %v1747_v38  ;;  %v1757_v13 = vadd.f32 %v1751_v39, %v3093_v28  ;;  %v1773_v52 = vmul.f32 0.6931472, %v2306_v56  ;;  %v1405_v17 = vmul.f32 %v1944_v62, %v64_v51 }
 0x41b   :  { %v1758_v22 = vadd.f32 %v1752_v36, %v1680_v34  ;;  %v1775_v33 = vmul.f32 0.6931472, %v2308_v32  ;;  %v1780_v27 = vsub.f32 %v1756_v12, %v1771_v42  ;;  %v1777_v24 = vmul.f32 0.6931472, %v2310_v49 }
 0x41c   :  { %v1759_v10 = vadd.f32 %v1753_v25, %v1681_v16  ;;  %v1781_v58 = vsub.f32 %v1757_v13, %v1773_v52  ;;  %v1410_v9 = vadd.f32 %v1404_v50, %v1392_v53  ;;  %v1411_v5 = vadd.f32 %v1405_v17, %v1393_v57 }
 0x41d   :  { %v1782_v61 = vsub.f32 %v1758_v22, %v1775_v33  ;;  %v1786_v1 = vsub.f32 %v3224_v3, %v1780_v27  ;;  %v789_v63 = vadd.f32 0.6931472, %v3226_v46 }
 0x41e   :  { %v1783_v7 = vsub.f32 %v1759_v10, %v1777_v24  ;;  %v1787_v44 = vsub.f32 %v3225_v19, %v1781_v58 }
 0x41f   :  { %v1788_v21 = vsub.f32 %v1410_v9, %v1782_v61  ;;  %v1791_v8 = vadd.f32 %v1790_v30, %v1786_v1 }
 0x420   :  { %v1789_v54 = vsub.f32 %v1411_v5, %v1783_v7 }
 0x421   :  { %v1792_v28 = vadd.f32 %v1791_v8, %v1787_v44 }
 0x423   :  { %v1793_v6 = vadd.f32 %v1792_v28, %v1788_v21 }
 0x425   :  { %v1794_v48 = vadd.f32 %v1793_v6, %v1789_v54 }
 0x427   :  { %1795 = vadd.xlane.f32.xlu0 %v1794_v48 }
 0x42b   :  { %790 = vadd.xlane.f32.xlu0 %v789_v63 }
 0x4b0   :  { %v1796_v11 = vpop.xlane.xlu0 %1795 }
 0x4b1   :  { %v1797_v60 = vadd.f32 275815.06, %v1796_v11 }
 0x4b3   :  { %1798 = vst [vmem:[%s3197_s15] sm:$0xff] %v1797_v60 }
 0x4b4   :  { %v791_v40 = vpop.xlane.xlu0 %790 }
 0x4b5   :  { %792 = vst [vmem:[%s3198_s14] sm:$0xff] %v791_v40 }

</bundles_post_ra>
